<compile_context>
chip_gen: v5e
topology: v5e:2x2
jax: 0.10.0
libtpu: 0.0.40
codegen_flags: <defaults>
</compile_context>

<pallas_src>
import jax
import jax.numpy as jnp
import numpy as np
from jax.experimental import pallas as pl
from jax.experimental.pallas import tpu as pltpu


# ----------------------------------------------------------------------------
# Fused kernel: LSTM1 -> LSTM2 -> mask -> max-pool(T) -> Linear, one invocation.
#
# Inputs (all full-array VMEM blocks, f32):
#   x      : (T, B, Cin)    time-major input
#   wih1   : (Cin, 4H)      lstm1 input weights (transposed, gate order i,f,g,o)
#   whh1   : (H, 4H)        lstm1 recurrent weights (transposed)
#   b1     : (1, 4H)        lstm1 combined bias (b_ih + b_hh)
#   wih2   : (H, 4H), whh2 : (H, 4H), b2 : (1, 4H)   lstm2 params
#   mask   : (T, B, 1)      time-major mask
#   wfc    : (H, C)         fc weight (transposed), bfc : (1, C)
# Output:
#   out    : (B, C)
# Scratch:
#   g1_sc  : (T, B, 4H)     hoisted layer-1 gate pre-activations
# ----------------------------------------------------------------------------
def fused_lstm_head_kernel(x_ref, wih1_ref, whh1_ref, b1_ref,
                           wih2_ref, whh2_ref, b2_ref,
                           mask_ref, wfc_ref, bfc_ref,
                           out_ref,
                           g1_sc):
    T, B, Cin = x_ref.shape
    H = whh1_ref.shape[0]
    H4 = 4 * H
    f32 = jnp.float32

    # Weights / bias loaded once; live across the (fully static) loop.
    whh1 = whh1_ref[...]
    wih2 = wih2_ref[...]
    whh2 = whh2_ref[...]
    b2 = b2_ref[...]

    # Per-lane affine constants implementing
    #   sigmoid(x) = 0.5 * tanh(0.5 * x) + 0.5   on the i/f/o gate lanes and
    #   tanh(x)                                  on the g gate lanes,
    # so all four gates need a single full-tile EUP tanh per step.
    lane = jax.lax.broadcasted_iota(jnp.int32, (1, H4), 1)
    is_g = (lane >= 2 * H) & (lane < 3 * H)
    g_scale = jnp.where(is_g, 1.0, 0.5).astype(f32)
    g_a = jnp.where(is_g, 1.0, 0.5).astype(f32)
    g_b = jnp.where(is_g, 0.0, 0.5).astype(f32)

    def cell(gates, c):
        act = g_a * jnp.tanh(g_scale * gates) + g_b
        i_g = act[:, 0 * H:1 * H]
        f_g = act[:, 1 * H:2 * H]
        g_g = act[:, 2 * H:3 * H]
        o_g = act[:, 3 * H:4 * H]
        c_new = f_g * c + i_g * g_g
        h_new = o_g * jnp.tanh(c_new)
        return h_new, c_new

    # Hoisted layer-1 input projection: one (T*B, Cin) x (Cin, 4H) matmul.
    x_flat = x_ref[...].reshape(T * B, Cin)
    g1 = jnp.dot(x_flat, wih1_ref[...], preferred_element_type=f32) + b1_ref[...]
    g1_sc[...] = g1.reshape(T, B, H4)

    zero = jnp.zeros((B, H), f32)
    h1, c1 = zero, zero
    h2, c2 = zero, zero
    pooled = jnp.full((B, H), -jnp.inf, f32)

    # Software-pipelined recurrence over the static (small) time axis.
    # Iteration t: layer-1 step t  and  layer-2 step t-1 (uses h1_{t-1}).
    for t in range(T + 1):
        if t < T:
            gates1 = g1_sc[t] + jnp.dot(h1, whh1, preferred_element_type=f32)
            h1_new, c1_new = cell(gates1, c1)
        if t > 0:
            # h1 still holds h1_{t-1} here (update is applied below).
            gates2 = (jnp.dot(h1, wih2, preferred_element_type=f32)
                      + jnp.dot(h2, whh2, preferred_element_type=f32) + b2)
            h2, c2 = cell(gates2, c2)
            # permute(0,2,1) * mask.unsqueeze(1) -> AdaptiveMaxPool1d(1) over T.
            pooled = jnp.maximum(pooled, h2 * mask_ref[t - 1])
        if t < T:
            h1, c1 = h1_new, c1_new

    # Head: Flatten -> Linear.
    out_ref[...] = (jnp.dot(pooled, wfc_ref[...], preferred_element_type=f32)
                    + bfc_ref[...])


# ----------------------------------------------------------------------------
# Wrapper: layout plumbing (batch_first -> time-major, weight transposes).
# ----------------------------------------------------------------------------
def model_forward(x_btc, mask_bt, params):
    B, T, Cin = x_btc.shape
    w_ih1, w_hh1, b_ih1, b_hh1 = params["lstm1"]
    w_ih2, w_hh2, b_ih2, b_hh2 = params["lstm2"]
    w_fc, b_fc = params["fc"]
    H = w_hh1.shape[1]
    CLS = w_fc.shape[0]
    H4 = 4 * H

    x_tbc = jnp.transpose(x_btc, (1, 0, 2)).astype(jnp.float32)                 # (T,B,Cin)
    mask_tb1 = jnp.transpose(mask_bt, (1, 0))[:, :, None].astype(jnp.float32)   # (T,B,1)

    wih1_t = jnp.asarray(w_ih1.T, jnp.float32)                                  # (Cin,4H)
    whh1_t = jnp.asarray(w_hh1.T, jnp.float32)                                  # (H,4H)
    b1 = jnp.asarray((b_ih1 + b_hh1).reshape(1, H4), jnp.float32)
    wih2_t = jnp.asarray(w_ih2.T, jnp.float32)                                  # (H,4H)
    whh2_t = jnp.asarray(w_hh2.T, jnp.float32)                                  # (H,4H)
    b2 = jnp.asarray((b_ih2 + b_hh2).reshape(1, H4), jnp.float32)
    wfc_t = jnp.asarray(w_fc.T, jnp.float32)                                    # (H,C)
    bfc = jnp.asarray(b_fc.reshape(1, CLS), jnp.float32)

    return pl.pallas_call(
        fused_lstm_head_kernel,
        out_shape=jax.ShapeDtypeStruct((B, CLS), jnp.float32),
        scratch_shapes=[
            pltpu.VMEM((T, B, H4), jnp.float32),   # layer-1 gate pre-activations
        ],
    )(x_tbc, wih1_t, whh1_t, b1, wih2_t, whh2_t, b2, mask_tb1, wfc_t, bfc)


# ----------------------------------------------------------------------------
# Pure-JAX reference (for correctness check).
# ----------------------------------------------------------------------------
def lstm_ref(x_btc, w_ih, w_hh, b_ih, b_hh):
    B, T, _ = x_btc.shape
    H = w_hh.shape[1]

    def step(carry, x_t):
        h, c = carry
        gates = x_t @ w_ih.T + b_ih + h @ w_hh.T + b_hh
        i, f, g, o = jnp.split(gates, 4, axis=-1)
        i, f, o = jax.nn.sigmoid(i), jax.nn.sigmoid(f), jax.nn.sigmoid(o)
        g = jnp.tanh(g)
        c = f * c + i * g
        h = o * jnp.tanh(c)
        return (h, c), h

    h0 = jnp.zeros((B, H), jnp.float32)
    c0 = jnp.zeros((B, H), jnp.float32)
    _, hs = jax.lax.scan(step, (h0, c0), jnp.transpose(x_btc, (1, 0, 2)))
    return jnp.transpose(hs, (1, 0, 2))              # (B, T, H)


def model_ref(x_btc, mask_bt, params):
    h1 = lstm_ref(x_btc, *params["lstm1"])
    h2 = lstm_ref(h1, *params["lstm2"])
    x = jnp.transpose(h2, (0, 2, 1))                 # (B, H, T)
    x = x * mask_bt[:, None, :]
    x = jnp.max(x, axis=-1)                          # (B, H)
    w_fc, b_fc = params["fc"]
    return x @ w_fc.T + b_fc


# ----------------------------------------------------------------------------
if __name__ == "__main__":
    # config: c_in=4, hidden_size=32, class_num=5, pos=-1
    B, T, C_IN, H, CLS = 2, 8, 4, 32, 5

    key = jax.random.PRNGKey(0)
    ks = jax.random.split(key, 12)
    s = 1.0 / np.sqrt(H)

    def u(k, shape):
        return jax.random.uniform(k, shape, jnp.float32, -s, s)

    params = {
        "lstm1": (u(ks[0], (4 * H, C_IN)), u(ks[1], (4 * H, H)),
                  u(ks[2], (4 * H,)), u(ks[3], (4 * H,))),
        "lstm2": (u(ks[4], (4 * H, H)), u(ks[5], (4 * H, H)),
                  u(ks[6], (4 * H,)), u(ks[7], (4 * H,))),
        "fc": (u(ks[8], (CLS, H)), u(ks[9], (CLS,))),
    }

    x = jax.random.normal(ks[10], (B, T, C_IN), jnp.float32)
    # mask: 1.0 for valid steps, 0.0 for padding (lengths = [T, T-2])
    lengths = jnp.array([T, T - 2], jnp.int32)
    mask = (jnp.arange(T)[None, :] < lengths[:, None]).astype(jnp.float32)

    fwd = jax.jit(model_forward)
    out = jax.block_until_ready(fwd(x, mask, params))
    ref = jax.block_until_ready(model_ref(x, mask, params))

    assert out.shape == (B, CLS), out.shape
    np.testing.assert_allclose(np.asarray(out), np.asarray(ref),
                               rtol=1e-4, atol=1e-4)
    print("KERNEL_OK")
</pallas_src>

<mosaic_0001>
module attributes {stable_mosaic.version = 11 : i64} {
  func.func @fused_lstm_head_kernel(%arg0: memref<8x2x4xf32, #tpu.memory_space<vmem>>, %arg1: memref<4x128xf32, #tpu.memory_space<vmem>>, %arg2: memref<32x128xf32, #tpu.memory_space<vmem>>, %arg3: memref<1x128xf32, #tpu.memory_space<vmem>>, %arg4: memref<32x128xf32, #tpu.memory_space<vmem>>, %arg5: memref<32x128xf32, #tpu.memory_space<vmem>>, %arg6: memref<1x128xf32, #tpu.memory_space<vmem>>, %arg7: memref<8x2x1xf32, #tpu.memory_space<vmem>>, %arg8: memref<32x5xf32, #tpu.memory_space<vmem>>, %arg9: memref<1x5xf32, #tpu.memory_space<vmem>>, %arg10: memref<2x5xf32, #tpu.memory_space<vmem>>, %arg11: memref<8x2x128xf32, #tpu.memory_space<vmem>>) attributes {dimension_semantics = [], scalar_prefetch = 0 : i64, scratch_operands = 1 : i64, tpu.core_type = #tpu.core_type<tc>} {
    %c0 = arith.constant 0 : index
    %c0_0 = arith.constant 0 : index
    %0 = vector.load %arg2[%c0, %c0_0] : memref<32x128xf32, #tpu.memory_space<vmem>>, vector<32x128xf32>
    %c0_1 = arith.constant 0 : index
    %c0_2 = arith.constant 0 : index
    %1 = vector.load %arg4[%c0_1, %c0_2] : memref<32x128xf32, #tpu.memory_space<vmem>>, vector<32x128xf32>
    %c0_3 = arith.constant 0 : index
    %c0_4 = arith.constant 0 : index
    %2 = vector.load %arg5[%c0_3, %c0_4] : memref<32x128xf32, #tpu.memory_space<vmem>>, vector<32x128xf32>
    %c0_5 = arith.constant 0 : index
    %c0_6 = arith.constant 0 : index
    %3 = vector.load %arg6[%c0_5, %c0_6] : memref<1x128xf32, #tpu.memory_space<vmem>>, vector<1x128xf32>
    %4 = tpu.iota {dimensions = array<i32: 1>} : vector<1x128xi32>
    %c64_i32 = arith.constant 64 : i32
    %5 = vector.broadcast %c64_i32 : i32 to vector<1x128xi32>
    %6 = arith.cmpi sge, %4, %5 : vector<1x128xi32>
    %c96_i32 = arith.constant 96 : i32
    %7 = vector.broadcast %c96_i32 : i32 to vector<1x128xi32>
    %8 = arith.cmpi slt, %4, %7 : vector<1x128xi32>
    %9 = arith.andi %6, %8 : vector<1x128xi1>
    %cst = arith.constant 1.000000e+00 : f32
    %cst_7 = arith.constant 5.000000e-01 : f32
    %10 = vector.broadcast %cst : f32 to vector<1x128xf32>
    %11 = vector.broadcast %cst_7 : f32 to vector<1x128xf32>
    %12 = arith.select %9, %10, %11 : vector<1x128xi1>, vector<1x128xf32>
    %cst_8 = arith.constant 1.000000e+00 : f32
    %cst_9 = arith.constant 5.000000e-01 : f32
    %13 = vector.broadcast %cst_8 : f32 to vector<1x128xf32>
    %14 = vector.broadcast %cst_9 : f32 to vector<1x128xf32>
    %15 = arith.select %9, %13, %14 : vector<1x128xi1>, vector<1x128xf32>
    %cst_10 = arith.constant 0.000000e+00 : f32
    %cst_11 = arith.constant 5.000000e-01 : f32
    %16 = vector.broadcast %cst_10 : f32 to vector<1x128xf32>
    %17 = vector.broadcast %cst_11 : f32 to vector<1x128xf32>
    %18 = arith.select %9, %16, %17 : vector<1x128xi1>, vector<1x128xf32>
    %c0_12 = arith.constant 0 : index
    %c0_13 = arith.constant 0 : index
    %c0_14 = arith.constant 0 : index
    %19 = vector.load %arg0[%c0_12, %c0_13, %c0_14] : memref<8x2x4xf32, #tpu.memory_space<vmem>>, vector<8x2x4xf32>
    %20 = vector.shape_cast %19 : vector<8x2x4xf32> to vector<16x4xf32>
    %c0_15 = arith.constant 0 : index
    %c0_16 = arith.constant 0 : index
    %21 = vector.load %arg1[%c0_15, %c0_16] : memref<4x128xf32, #tpu.memory_space<vmem>>, vector<4x128xf32>
    %cst_17 = arith.constant dense<0.000000e+00> : vector<16x128xf32>
    %22 = tpu.matmul %20, %21, %cst_17 {dimension_numbers = #tpu.dot_dimension_numbers<[1], [0], [0], [1], [0, 0, 1, 1], [], []>} : vector<16x4xf32>, vector<4x128xf32>, vector<16x128xf32> -> vector<16x128xf32>
    %c0_18 = arith.constant 0 : index
    %c0_19 = arith.constant 0 : index
    %23 = vector.load %arg3[%c0_18, %c0_19] : memref<1x128xf32, #tpu.memory_space<vmem>>, vector<1x128xf32>
    %24 = vector.broadcast %23 : vector<1x128xf32> to vector<16x128xf32>
    %25 = arith.addf %22, %24 : vector<16x128xf32>
    %26 = vector.shape_cast %25 : vector<16x128xf32> to vector<8x2x128xf32>
    %c0_20 = arith.constant 0 : index
    %c0_21 = arith.constant 0 : index
    %c0_22 = arith.constant 0 : index
    %27 = vector.load %arg11[%c0_20, %c0_21, %c0_22] : memref<8x2x128xf32, #tpu.memory_space<vmem>>, vector<8x2x128xf32>
    tpu.vector_store %arg11[%c0_20, %c0_21, %c0_22], %26 {strides = array<i32>} : memref<8x2x128xf32, #tpu.memory_space<vmem>>, vector<8x2x128xf32>,
    %cst_23 = arith.constant 0.000000e+00 : f32
    %28 = vector.broadcast %cst_23 : f32 to vector<2x32xf32>
    %cst_24 = arith.constant 0xFF800000 : f32
    %29 = vector.broadcast %cst_24 : f32 to vector<2x32xf32>
    %c0_25 = arith.constant 0 : index
    %c0_26 = arith.constant 0 : index
    %c0_27 = arith.constant 0 : index
    %30 = vector.load %arg11[%c0_25, %c0_26, %c0_27] : memref<8x2x128xf32, #tpu.memory_space<vmem>>, vector<1x2x128xf32>
    %31 = vector.shape_cast %30 : vector<1x2x128xf32> to vector<2x128xf32>
    %cst_28 = arith.constant dense<0.000000e+00> : vector<2x128xf32>
    %32 = tpu.matmul %28, %0, %cst_28 {dimension_numbers = #tpu.dot_dimension_numbers<[1], [0], [0], [1], [0, 0, 1, 1], [], []>} : vector<2x32xf32>, vector<32x128xf32>, vector<2x128xf32> -> vector<2x128xf32>
    %33 = arith.addf %31, %32 : vector<2x128xf32>
    %34 = vector.broadcast %12 : vector<1x128xf32> to vector<2x128xf32>
    %35 = arith.mulf %34, %33 : vector<2x128xf32>
    %36 = math.tanh %35 : vector<2x128xf32>
    %37 = vector.broadcast %15 : vector<1x128xf32> to vector<2x128xf32>
    %38 = arith.mulf %37, %36 : vector<2x128xf32>
    %39 = vector.broadcast %18 : vector<1x128xf32> to vector<2x128xf32>
    %40 = arith.addf %38, %39 : vector<2x128xf32>
    %41 = vector.extract_strided_slice %40 {offsets = [0, 0], sizes = [2, 32], strides = [1, 1]} : vector<2x128xf32> to vector<2x32xf32>
    %42 = vector.extract_strided_slice %40 {offsets = [0, 32], sizes = [2, 32], strides = [1, 1]} : vector<2x128xf32> to vector<2x32xf32>
    %43 = vector.extract_strided_slice %40 {offsets = [0, 64], sizes = [2, 32], strides = [1, 1]} : vector<2x128xf32> to vector<2x32xf32>
    %44 = vector.extract_strided_slice %40 {offsets = [0, 96], sizes = [2, 32], strides = [1, 1]} : vector<2x128xf32> to vector<2x32xf32>
    %45 = arith.mulf %42, %28 : vector<2x32xf32>
    %46 = arith.mulf %41, %43 : vector<2x32xf32>
    %47 = arith.addf %45, %46 : vector<2x32xf32>
    %48 = math.tanh %47 : vector<2x32xf32>
    %49 = arith.mulf %44, %48 : vector<2x32xf32>
    %c1 = arith.constant 1 : index
    %c0_29 = arith.constant 0 : index
    %c0_30 = arith.constant 0 : index
    %50 = vector.load %arg11[%c1, %c0_29, %c0_30] : memref<8x2x128xf32, #tpu.memory_space<vmem>>, vector<1x2x128xf32>
    %51 = vector.shape_cast %50 : vector<1x2x128xf32> to vector<2x128xf32>
    %cst_31 = arith.constant dense<0.000000e+00> : vector<2x128xf32>
    %52 = tpu.matmul %49, %0, %cst_31 {dimension_numbers = #tpu.dot_dimension_numbers<[1], [0], [0], [1], [0, 0, 1, 1], [], []>} : vector<2x32xf32>, vector<32x128xf32>, vector<2x128xf32> -> vector<2x128xf32>
    %53 = arith.addf %51, %52 : vector<2x128xf32>
    %54 = vector.broadcast %12 : vector<1x128xf32> to vector<2x128xf32>
    %55 = arith.mulf %54, %53 : vector<2x128xf32>
    %56 = math.tanh %55 : vector<2x128xf32>
    %57 = vector.broadcast %15 : vector<1x128xf32> to vector<2x128xf32>
    %58 = arith.mulf %57, %56 : vector<2x128xf32>
    %59 = vector.broadcast %18 : vector<1x128xf32> to vector<2x128xf32>
    %60 = arith.addf %58, %59 : vector<2x128xf32>
    %61 = vector.extract_strided_slice %60 {offsets = [0, 0], sizes = [2, 32], strides = [1, 1]} : vector<2x128xf32> to vector<2x32xf32>
    %62 = vector.extract_strided_slice %60 {offsets = [0, 32], sizes = [2, 32], strides = [1, 1]} : vector<2x128xf32> to vector<2x32xf32>
    %63 = vector.extract_strided_slice %60 {offsets = [0, 64], sizes = [2, 32], strides = [1, 1]} : vector<2x128xf32> to vector<2x32xf32>
    %64 = vector.extract_strided_slice %60 {offsets = [0, 96], sizes = [2, 32], strides = [1, 1]} : vector<2x128xf32> to vector<2x32xf32>
    %65 = arith.mulf %62, %47 : vector<2x32xf32>
    %66 = arith.mulf %61, %63 : vector<2x32xf32>
    %67 = arith.addf %65, %66 : vector<2x32xf32>
    %68 = math.tanh %67 : vector<2x32xf32>
    %69 = arith.mulf %64, %68 : vector<2x32xf32>
    %cst_32 = arith.constant dense<0.000000e+00> : vector<2x128xf32>
    %70 = tpu.matmul %49, %1, %cst_32 {dimension_numbers = #tpu.dot_dimension_numbers<[1], [0], [0], [1], [0, 0, 1, 1], [], []>} : vector<2x32xf32>, vector<32x128xf32>, vector<2x128xf32> -> vector<2x128xf32>
    %cst_33 = arith.constant dense<0.000000e+00> : vector<2x128xf32>
    %71 = tpu.matmul %28, %2, %cst_33 {dimension_numbers = #tpu.dot_dimension_numbers<[1], [0], [0], [1], [0, 0, 1, 1], [], []>} : vector<2x32xf32>, vector<32x128xf32>, vector<2x128xf32> -> vector<2x128xf32>
    %72 = arith.addf %70, %71 : vector<2x128xf32>
    %73 = vector.broadcast %3 : vector<1x128xf32> to vector<2x128xf32>
    %74 = arith.addf %72, %73 : vector<2x128xf32>
    %75 = vector.broadcast %12 : vector<1x128xf32> to vector<2x128xf32>
    %76 = arith.mulf %75, %74 : vector<2x128xf32>
    %77 = math.tanh %76 : vector<2x128xf32>
    %78 = vector.broadcast %15 : vector<1x128xf32> to vector<2x128xf32>
    %79 = arith.mulf %78, %77 : vector<2x128xf32>
    %80 = vector.broadcast %18 : vector<1x128xf32> to vector<2x128xf32>
    %81 = arith.addf %79, %80 : vector<2x128xf32>
    %82 = vector.extract_strided_slice %81 {offsets = [0, 0], sizes = [2, 32], strides = [1, 1]} : vector<2x128xf32> to vector<2x32xf32>
    %83 = vector.extract_strided_slice %81 {offsets = [0, 32], sizes = [2, 32], strides = [1, 1]} : vector<2x128xf32> to vector<2x32xf32>
    %84 = vector.extract_strided_slice %81 {offsets = [0, 64], sizes = [2, 32], strides = [1, 1]} : vector<2x128xf32> to vector<2x32xf32>
    %85 = vector.extract_strided_slice %81 {offsets = [0, 96], sizes = [2, 32], strides = [1, 1]} : vector<2x128xf32> to vector<2x32xf32>
    %86 = arith.mulf %83, %28 : vector<2x32xf32>
    %87 = arith.mulf %82, %84 : vector<2x32xf32>
    %88 = arith.addf %86, %87 : vector<2x32xf32>
    %89 = math.tanh %88 : vector<2x32xf32>
    %90 = arith.mulf %85, %89 : vector<2x32xf32>
    %c0_34 = arith.constant 0 : index
    %c0_35 = arith.constant 0 : index
    %c0_36 = arith.constant 0 : index
    %91 = vector.load %arg7[%c0_34, %c0_35, %c0_36] : memref<8x2x1xf32, #tpu.memory_space<vmem>>, vector<1x2x1xf32>
    %92 = vector.shape_cast %91 : vector<1x2x1xf32> to vector<2x1xf32>
    %93 = vector.broadcast %92 : vector<2x1xf32> to vector<2x32xf32>
    %94 = arith.mulf %90, %93 : vector<2x32xf32>
    %95 = arith.maximumf %29, %94 : vector<2x32xf32>
    %c2 = arith.constant 2 : index
    %c0_37 = arith.constant 0 : index
    %c0_38 = arith.constant 0 : index
    %96 = vector.load %arg11[%c2, %c0_37, %c0_38] : memref<8x2x128xf32, #tpu.memory_space<vmem>>, vector<1x2x128xf32>
    %97 = vector.shape_cast %96 : vector<1x2x128xf32> to vector<2x128xf32>
    %cst_39 = arith.constant dense<0.000000e+00> : vector<2x128xf32>
    %98 = tpu.matmul %69, %0, %cst_39 {dimension_numbers = #tpu.dot_dimension_numbers<[1], [0], [0], [1], [0, 0, 1, 1], [], []>} : vector<2x32xf32>, vector<32x128xf32>, vector<2x128xf32> -> vector<2x128xf32>
    %99 = arith.addf %97, %98 : vector<2x128xf32>
    %100 = vector.broadcast %12 : vector<1x128xf32> to vector<2x128xf32>
    %101 = arith.mulf %100, %99 : vector<2x128xf32>
    %102 = math.tanh %101 : vector<2x128xf32>
    %103 = vector.broadcast %15 : vector<1x128xf32> to vector<2x128xf32>
    %104 = arith.mulf %103, %102 : vector<2x128xf32>
    %105 = vector.broadcast %18 : vector<1x128xf32> to vector<2x128xf32>
    %106 = arith.addf %104, %105 : vector<2x128xf32>
    %107 = vector.extract_strided_slice %106 {offsets = [0, 0], sizes = [2, 32], strides = [1, 1]} : vector<2x128xf32> to vector<2x32xf32>
    %108 = vector.extract_strided_slice %106 {offsets = [0, 32], sizes = [2, 32], strides = [1, 1]} : vector<2x128xf32> to vector<2x32xf32>
    %109 = vector.extract_strided_slice %106 {offsets = [0, 64], sizes = [2, 32], strides = [1, 1]} : vector<2x128xf32> to vector<2x32xf32>
    %110 = vector.extract_strided_slice %106 {offsets = [0, 96], sizes = [2, 32], strides = [1, 1]} : vector<2x128xf32> to vector<2x32xf32>
    %111 = arith.mulf %108, %67 : vector<2x32xf32>
    %112 = arith.mulf %107, %109 : vector<2x32xf32>
    %113 = arith.addf %111, %112 : vector<2x32xf32>
    %114 = math.tanh %113 : vector<2x32xf32>
    %115 = arith.mulf %110, %114 : vector<2x32xf32>
    %cst_40 = arith.constant dense<0.000000e+00> : vector<2x128xf32>
    %116 = tpu.matmul %69, %1, %cst_40 {dimension_numbers = #tpu.dot_dimension_numbers<[1], [0], [0], [1], [0, 0, 1, 1], [], []>} : vector<2x32xf32>, vector<32x128xf32>, vector<2x128xf32> -> vector<2x128xf32>
    %cst_41 = arith.constant dense<0.000000e+00> : vector<2x128xf32>
    %117 = tpu.matmul %90, %2, %cst_41 {dimension_numbers = #tpu.dot_dimension_numbers<[1], [0], [0], [1], [0, 0, 1, 1], [], []>} : vector<2x32xf32>, vector<32x128xf32>, vector<2x128xf32> -> vector<2x128xf32>
    %118 = arith.addf %116, %117 : vector<2x128xf32>
    %119 = vector.broadcast %3 : vector<1x128xf32> to vector<2x128xf32>
    %120 = arith.addf %118, %119 : vector<2x128xf32>
    %121 = vector.broadcast %12 : vector<1x128xf32> to vector<2x128xf32>
    %122 = arith.mulf %121, %120 : vector<2x128xf32>
    %123 = math.tanh %122 : vector<2x128xf32>
    %124 = vector.broadcast %15 : vector<1x128xf32> to vector<2x128xf32>
    %125 = arith.mulf %124, %123 : vector<2x128xf32>
    %126 = vector.broadcast %18 : vector<1x128xf32> to vector<2x128xf32>
    %127 = arith.addf %125, %126 : vector<2x128xf32>
    %128 = vector.extract_strided_slice %127 {offsets = [0, 0], sizes = [2, 32], strides = [1, 1]} : vector<2x128xf32> to vector<2x32xf32>
    %129 = vector.extract_strided_slice %127 {offsets = [0, 32], sizes = [2, 32], strides = [1, 1]} : vector<2x128xf32> to vector<2x32xf32>
    %130 = vector.extract_strided_slice %127 {offsets = [0, 64], sizes = [2, 32], strides = [1, 1]} : vector<2x128xf32> to vector<2x32xf32>
    %131 = vector.extract_strided_slice %127 {offsets = [0, 96], sizes = [2, 32], strides = [1, 1]} : vector<2x128xf32> to vector<2x32xf32>
    %132 = arith.mulf %129, %88 : vector<2x32xf32>
    %133 = arith.mulf %128, %130 : vector<2x32xf32>
    %134 = arith.addf %132, %133 : vector<2x32xf32>
    %135 = math.tanh %134 : vector<2x32xf32>
    %136 = arith.mulf %131, %135 : vector<2x32xf32>
    %c1_42 = arith.constant 1 : index
    %c0_43 = arith.constant 0 : index
    %c0_44 = arith.constant 0 : index
    %137 = vector.load %arg7[%c1_42, %c0_43, %c0_44] : memref<8x2x1xf32, #tpu.memory_space<vmem>>, vector<1x2x1xf32>
    %138 = vector.shape_cast %137 : vector<1x2x1xf32> to vector<2x1xf32>
    %139 = vector.broadcast %138 : vector<2x1xf32> to vector<2x32xf32>
    %140 = arith.mulf %136, %139 : vector<2x32xf32>
    %141 = arith.maximumf %95, %140 : vector<2x32xf32>
    %c3 = arith.constant 3 : index
    %c0_45 = arith.constant 0 : index
    %c0_46 = arith.constant 0 : index
    %142 = vector.load %arg11[%c3, %c0_45, %c0_46] : memref<8x2x128xf32, #tpu.memory_space<vmem>>, vector<1x2x128xf32>
    %143 = vector.shape_cast %142 : vector<1x2x128xf32> to vector<2x128xf32>
    %cst_47 = arith.constant dense<0.000000e+00> : vector<2x128xf32>
    %144 = tpu.matmul %115, %0, %cst_47 {dimension_numbers = #tpu.dot_dimension_numbers<[1], [0], [0], [1], [0, 0, 1, 1], [], []>} : vector<2x32xf32>, vector<32x128xf32>, vector<2x128xf32> -> vector<2x128xf32>
    %145 = arith.addf %143, %144 : vector<2x128xf32>
    %146 = vector.broadcast %12 : vector<1x128xf32> to vector<2x128xf32>
    %147 = arith.mulf %146, %145 : vector<2x128xf32>
    %148 = math.tanh %147 : vector<2x128xf32>
    %149 = vector.broadcast %15 : vector<1x128xf32> to vector<2x128xf32>
    %150 = arith.mulf %149, %148 : vector<2x128xf32>
    %151 = vector.broadcast %18 : vector<1x128xf32> to vector<2x128xf32>
    %152 = arith.addf %150, %151 : vector<2x128xf32>
    %153 = vector.extract_strided_slice %152 {offsets = [0, 0], sizes = [2, 32], strides = [1, 1]} : vector<2x128xf32> to vector<2x32xf32>
    %154 = vector.extract_strided_slice %152 {offsets = [0, 32], sizes = [2, 32], strides = [1, 1]} : vector<2x128xf32> to vector<2x32xf32>
    %155 = vector.extract_strided_slice %152 {offsets = [0, 64], sizes = [2, 32], strides = [1, 1]} : vector<2x128xf32> to vector<2x32xf32>
    %156 = vector.extract_strided_slice %152 {offsets = [0, 96], sizes = [2, 32], strides = [1, 1]} : vector<2x128xf32> to vector<2x32xf32>
    %157 = arith.mulf %154, %113 : vector<2x32xf32>
    %158 = arith.mulf %153, %155 : vector<2x32xf32>
    %159 = arith.addf %157, %158 : vector<2x32xf32>
    %160 = math.tanh %159 : vector<2x32xf32>
    %161 = arith.mulf %156, %160 : vector<2x32xf32>
    %cst_48 = arith.constant dense<0.000000e+00> : vector<2x128xf32>
    %162 = tpu.matmul %115, %1, %cst_48 {dimension_numbers = #tpu.dot_dimension_numbers<[1], [0], [0], [1], [0, 0, 1, 1], [], []>} : vector<2x32xf32>, vector<32x128xf32>, vector<2x128xf32> -> vector<2x128xf32>
    %cst_49 = arith.constant dense<0.000000e+00> : vector<2x128xf32>
    %163 = tpu.matmul %136, %2, %cst_49 {dimension_numbers = #tpu.dot_dimension_numbers<[1], [0], [0], [1], [0, 0, 1, 1], [], []>} : vector<2x32xf32>, vector<32x128xf32>, vector<2x128xf32> -> vector<2x128xf32>
    %164 = arith.addf %162, %163 : vector<2x128xf32>
    %165 = vector.broadcast %3 : vector<1x128xf32> to vector<2x128xf32>
    %166 = arith.addf %164, %165 : vector<2x128xf32>
    %167 = vector.broadcast %12 : vector<1x128xf32> to vector<2x128xf32>
    %168 = arith.mulf %167, %166 : vector<2x128xf32>
    %169 = math.tanh %168 : vector<2x128xf32>
    %170 = vector.broadcast %15 : vector<1x128xf32> to vector<2x128xf32>
    %171 = arith.mulf %170, %169 : vector<2x128xf32>
    %172 = vector.broadcast %18 : vector<1x128xf32> to vector<2x128xf32>
    %173 = arith.addf %171, %172 : vector<2x128xf32>
    %174 = vector.extract_strided_slice %173 {offsets = [0, 0], sizes = [2, 32], strides = [1, 1]} : vector<2x128xf32> to vector<2x32xf32>
    %175 = vector.extract_strided_slice %173 {offsets = [0, 32], sizes = [2, 32], strides = [1, 1]} : vector<2x128xf32> to vector<2x32xf32>
    %176 = vector.extract_strided_slice %173 {offsets = [0, 64], sizes = [2, 32], strides = [1, 1]} : vector<2x128xf32> to vector<2x32xf32>
    %177 = vector.extract_strided_slice %173 {offsets = [0, 96], sizes = [2, 32], strides = [1, 1]} : vector<2x128xf32> to vector<2x32xf32>
    %178 = arith.mulf %175, %134 : vector<2x32xf32>
    %179 = arith.mulf %174, %176 : vector<2x32xf32>
    %180 = arith.addf %178, %179 : vector<2x32xf32>
    %181 = math.tanh %180 : vector<2x32xf32>
    %182 = arith.mulf %177, %181 : vector<2x32xf32>
    %c2_50 = arith.constant 2 : index
    %c0_51 = arith.constant 0 : index
    %c0_52 = arith.constant 0 : index
    %183 = vector.load %arg7[%c2_50, %c0_51, %c0_52] : memref<8x2x1xf32, #tpu.memory_space<vmem>>, vector<1x2x1xf32>
    %184 = vector.shape_cast %183 : vector<1x2x1xf32> to vector<2x1xf32>
    %185 = vector.broadcast %184 : vector<2x1xf32> to vector<2x32xf32>
    %186 = arith.mulf %182, %185 : vector<2x32xf32>
    %187 = arith.maximumf %141, %186 : vector<2x32xf32>
    %c4 = arith.constant 4 : index
    %c0_53 = arith.constant 0 : index
    %c0_54 = arith.constant 0 : index
    %188 = vector.load %arg11[%c4, %c0_53, %c0_54] : memref<8x2x128xf32, #tpu.memory_space<vmem>>, vector<1x2x128xf32>
    %189 = vector.shape_cast %188 : vector<1x2x128xf32> to vector<2x128xf32>
    %cst_55 = arith.constant dense<0.000000e+00> : vector<2x128xf32>
    %190 = tpu.matmul %161, %0, %cst_55 {dimension_numbers = #tpu.dot_dimension_numbers<[1], [0], [0], [1], [0, 0, 1, 1], [], []>} : vector<2x32xf32>, vector<32x128xf32>, vector<2x128xf32> -> vector<2x128xf32>
    %191 = arith.addf %189, %190 : vector<2x128xf32>
    %192 = vector.broadcast %12 : vector<1x128xf32> to vector<2x128xf32>
    %193 = arith.mulf %192, %191 : vector<2x128xf32>
    %194 = math.tanh %193 : vector<2x128xf32>
    %195 = vector.broadcast %15 : vector<1x128xf32> to vector<2x128xf32>
    %196 = arith.mulf %195, %194 : vector<2x128xf32>
    %197 = vector.broadcast %18 : vector<1x128xf32> to vector<2x128xf32>
    %198 = arith.addf %196, %197 : vector<2x128xf32>
    %199 = vector.extract_strided_slice %198 {offsets = [0, 0], sizes = [2, 32], strides = [1, 1]} : vector<2x128xf32> to vector<2x32xf32>
    %200 = vector.extract_strided_slice %198 {offsets = [0, 32], sizes = [2, 32], strides = [1, 1]} : vector<2x128xf32> to vector<2x32xf32>
    %201 = vector.extract_strided_slice %198 {offsets = [0, 64], sizes = [2, 32], strides = [1, 1]} : vector<2x128xf32> to vector<2x32xf32>
    %202 = vector.extract_strided_slice %198 {offsets = [0, 96], sizes = [2, 32], strides = [1, 1]} : vector<2x128xf32> to vector<2x32xf32>
    %203 = arith.mulf %200, %159 : vector<2x32xf32>
    %204 = arith.mulf %199, %201 : vector<2x32xf32>
    %205 = arith.addf %203, %204 : vector<2x32xf32>
    %206 = math.tanh %205 : vector<2x32xf32>
    %207 = arith.mulf %202, %206 : vector<2x32xf32>
    %cst_56 = arith.constant dense<0.000000e+00> : vector<2x128xf32>
    %208 = tpu.matmul %161, %1, %cst_56 {dimension_numbers = #tpu.dot_dimension_numbers<[1], [0], [0], [1], [0, 0, 1, 1], [], []>} : vector<2x32xf32>, vector<32x128xf32>, vector<2x128xf32> -> vector<2x128xf32>
    %cst_57 = arith.constant dense<0.000000e+00> : vector<2x128xf32>
    %209 = tpu.matmul %182, %2, %cst_57 {dimension_numbers = #tpu.dot_dimension_numbers<[1], [0], [0], [1], [0, 0, 1, 1], [], []>} : vector<2x32xf32>, vector<32x128xf32>, vector<2x128xf32> -> vector<2x128xf32>
    %210 = arith.addf %208, %209 : vector<2x128xf32>
    %211 = vector.broadcast %3 : vector<1x128xf32> to vector<2x128xf32>
    %212 = arith.addf %210, %211 : vector<2x128xf32>
    %213 = vector.broadcast %12 : vector<1x128xf32> to vector<2x128xf32>
    %214 = arith.mulf %213, %212 : vector<2x128xf32>
    %215 = math.tanh %214 : vector<2x128xf32>
    %216 = vector.broadcast %15 : vector<1x128xf32> to vector<2x128xf32>
    %217 = arith.mulf %216, %215 : vector<2x128xf32>
    %218 = vector.broadcast %18 : vector<1x128xf32> to vector<2x128xf32>
    %219 = arith.addf %217, %218 : vector<2x128xf32>
    %220 = vector.extract_strided_slice %219 {offsets = [0, 0], sizes = [2, 32], strides = [1, 1]} : vector<2x128xf32> to vector<2x32xf32>
    %221 = vector.extract_strided_slice %219 {offsets = [0, 32], sizes = [2, 32], strides = [1, 1]} : vector<2x128xf32> to vector<2x32xf32>
    %222 = vector.extract_strided_slice %219 {offsets = [0, 64], sizes = [2, 32], strides = [1, 1]} : vector<2x128xf32> to vector<2x32xf32>
    %223 = vector.extract_strided_slice %219 {offsets = [0, 96], sizes = [2, 32], strides = [1, 1]} : vector<2x128xf32> to vector<2x32xf32>
    %224 = arith.mulf %221, %180 : vector<2x32xf32>
    %225 = arith.mulf %220, %222 : vector<2x32xf32>
    %226 = arith.addf %224, %225 : vector<2x32xf32>
    %227 = math.tanh %226 : vector<2x32xf32>
    %228 = arith.mulf %223, %227 : vector<2x32xf32>
    %c3_58 = arith.constant 3 : index
    %c0_59 = arith.constant 0 : index
    %c0_60 = arith.constant 0 : index
    %229 = vector.load %arg7[%c3_58, %c0_59, %c0_60] : memref<8x2x1xf32, #tpu.memory_space<vmem>>, vector<1x2x1xf32>
    %230 = vector.shape_cast %229 : vector<1x2x1xf32> to vector<2x1xf32>
    %231 = vector.broadcast %230 : vector<2x1xf32> to vector<2x32xf32>
    %232 = arith.mulf %228, %231 : vector<2x32xf32>
    %233 = arith.maximumf %187, %232 : vector<2x32xf32>
    %c5 = arith.constant 5 : index
    %c0_61 = arith.constant 0 : index
    %c0_62 = arith.constant 0 : index
    %234 = vector.load %arg11[%c5, %c0_61, %c0_62] : memref<8x2x128xf32, #tpu.memory_space<vmem>>, vector<1x2x128xf32>
    %235 = vector.shape_cast %234 : vector<1x2x128xf32> to vector<2x128xf32>
    %cst_63 = arith.constant dense<0.000000e+00> : vector<2x128xf32>
    %236 = tpu.matmul %207, %0, %cst_63 {dimension_numbers = #tpu.dot_dimension_numbers<[1], [0], [0], [1], [0, 0, 1, 1], [], []>} : vector<2x32xf32>, vector<32x128xf32>, vector<2x128xf32> -> vector<2x128xf32>
    %237 = arith.addf %235, %236 : vector<2x128xf32>
    %238 = vector.broadcast %12 : vector<1x128xf32> to vector<2x128xf32>
    %239 = arith.mulf %238, %237 : vector<2x128xf32>
    %240 = math.tanh %239 : vector<2x128xf32>
    %241 = vector.broadcast %15 : vector<1x128xf32> to vector<2x128xf32>
    %242 = arith.mulf %241, %240 : vector<2x128xf32>
    %243 = vector.broadcast %18 : vector<1x128xf32> to vector<2x128xf32>
    %244 = arith.addf %242, %243 : vector<2x128xf32>
    %245 = vector.extract_strided_slice %244 {offsets = [0, 0], sizes = [2, 32], strides = [1, 1]} : vector<2x128xf32> to vector<2x32xf32>
    %246 = vector.extract_strided_slice %244 {offsets = [0, 32], sizes = [2, 32], strides = [1, 1]} : vector<2x128xf32> to vector<2x32xf32>
    %247 = vector.extract_strided_slice %244 {offsets = [0, 64], sizes = [2, 32], strides = [1, 1]} : vector<2x128xf32> to vector<2x32xf32>
    %248 = vector.extract_strided_slice %244 {offsets = [0, 96], sizes = [2, 32], strides = [1, 1]} : vector<2x128xf32> to vector<2x32xf32>
    %249 = arith.mulf %246, %205 : vector<2x32xf32>
    %250 = arith.mulf %245, %247 : vector<2x32xf32>
    %251 = arith.addf %249, %250 : vector<2x32xf32>
    %252 = math.tanh %251 : vector<2x32xf32>
    %253 = arith.mulf %248, %252 : vector<2x32xf32>
    %cst_64 = arith.constant dense<0.000000e+00> : vector<2x128xf32>
    %254 = tpu.matmul %207, %1, %cst_64 {dimension_numbers = #tpu.dot_dimension_numbers<[1], [0], [0], [1], [0, 0, 1, 1], [], []>} : vector<2x32xf32>, vector<32x128xf32>, vector<2x128xf32> -> vector<2x128xf32>
    %cst_65 = arith.constant dense<0.000000e+00> : vector<2x128xf32>
    %255 = tpu.matmul %228, %2, %cst_65 {dimension_numbers = #tpu.dot_dimension_numbers<[1], [0], [0], [1], [0, 0, 1, 1], [], []>} : vector<2x32xf32>, vector<32x128xf32>, vector<2x128xf32> -> vector<2x128xf32>
    %256 = arith.addf %254, %255 : vector<2x128xf32>
    %257 = vector.broadcast %3 : vector<1x128xf32> to vector<2x128xf32>
    %258 = arith.addf %256, %257 : vector<2x128xf32>
    %259 = vector.broadcast %12 : vector<1x128xf32> to vector<2x128xf32>
    %260 = arith.mulf %259, %258 : vector<2x128xf32>
    %261 = math.tanh %260 : vector<2x128xf32>
    %262 = vector.broadcast %15 : vector<1x128xf32> to vector<2x128xf32>
    %263 = arith.mulf %262, %261 : vector<2x128xf32>
    %264 = vector.broadcast %18 : vector<1x128xf32> to vector<2x128xf32>
    %265 = arith.addf %263, %264 : vector<2x128xf32>
    %266 = vector.extract_strided_slice %265 {offsets = [0, 0], sizes = [2, 32], strides = [1, 1]} : vector<2x128xf32> to vector<2x32xf32>
    %267 = vector.extract_strided_slice %265 {offsets = [0, 32], sizes = [2, 32], strides = [1, 1]} : vector<2x128xf32> to vector<2x32xf32>
    %268 = vector.extract_strided_slice %265 {offsets = [0, 64], sizes = [2, 32], strides = [1, 1]} : vector<2x128xf32> to vector<2x32xf32>
    %269 = vector.extract_strided_slice %265 {offsets = [0, 96], sizes = [2, 32], strides = [1, 1]} : vector<2x128xf32> to vector<2x32xf32>
    %270 = arith.mulf %267, %226 : vector<2x32xf32>
    %271 = arith.mulf %266, %268 : vector<2x32xf32>
    %272 = arith.addf %270, %271 : vector<2x32xf32>
    %273 = math.tanh %272 : vector<2x32xf32>
    %274 = arith.mulf %269, %273 : vector<2x32xf32>
    %c4_66 = arith.constant 4 : index
    %c0_67 = arith.constant 0 : index
    %c0_68 = arith.constant 0 : index
    %275 = vector.load %arg7[%c4_66, %c0_67, %c0_68] : memref<8x2x1xf32, #tpu.memory_space<vmem>>, vector<1x2x1xf32>
    %276 = vector.shape_cast %275 : vector<1x2x1xf32> to vector<2x1xf32>
    %277 = vector.broadcast %276 : vector<2x1xf32> to vector<2x32xf32>
    %278 = arith.mulf %274, %277 : vector<2x32xf32>
    %279 = arith.maximumf %233, %278 : vector<2x32xf32>
    %c6 = arith.constant 6 : index
    %c0_69 = arith.constant 0 : index
    %c0_70 = arith.constant 0 : index
    %280 = vector.load %arg11[%c6, %c0_69, %c0_70] : memref<8x2x128xf32, #tpu.memory_space<vmem>>, vector<1x2x128xf32>
    %281 = vector.shape_cast %280 : vector<1x2x128xf32> to vector<2x128xf32>
    %cst_71 = arith.constant dense<0.000000e+00> : vector<2x128xf32>
    %282 = tpu.matmul %253, %0, %cst_71 {dimension_numbers = #tpu.dot_dimension_numbers<[1], [0], [0], [1], [0, 0, 1, 1], [], []>} : vector<2x32xf32>, vector<32x128xf32>, vector<2x128xf32> -> vector<2x128xf32>
    %283 = arith.addf %281, %282 : vector<2x128xf32>
    %284 = vector.broadcast %12 : vector<1x128xf32> to vector<2x128xf32>
    %285 = arith.mulf %284, %283 : vector<2x128xf32>
    %286 = math.tanh %285 : vector<2x128xf32>
    %287 = vector.broadcast %15 : vector<1x128xf32> to vector<2x128xf32>
    %288 = arith.mulf %287, %286 : vector<2x128xf32>
    %289 = vector.broadcast %18 : vector<1x128xf32> to vector<2x128xf32>
    %290 = arith.addf %288, %289 : vector<2x128xf32>
    %291 = vector.extract_strided_slice %290 {offsets = [0, 0], sizes = [2, 32], strides = [1, 1]} : vector<2x128xf32> to vector<2x32xf32>
    %292 = vector.extract_strided_slice %290 {offsets = [0, 32], sizes = [2, 32], strides = [1, 1]} : vector<2x128xf32> to vector<2x32xf32>
    %293 = vector.extract_strided_slice %290 {offsets = [0, 64], sizes = [2, 32], strides = [1, 1]} : vector<2x128xf32> to vector<2x32xf32>
    %294 = vector.extract_strided_slice %290 {offsets = [0, 96], sizes = [2, 32], strides = [1, 1]} : vector<2x128xf32> to vector<2x32xf32>
    %295 = arith.mulf %292, %251 : vector<2x32xf32>
    %296 = arith.mulf %291, %293 : vector<2x32xf32>
    %297 = arith.addf %295, %296 : vector<2x32xf32>
    %298 = math.tanh %297 : vector<2x32xf32>
    %299 = arith.mulf %294, %298 : vector<2x32xf32>
    %cst_72 = arith.constant dense<0.000000e+00> : vector<2x128xf32>
    %300 = tpu.matmul %253, %1, %cst_72 {dimension_numbers = #tpu.dot_dimension_numbers<[1], [0], [0], [1], [0, 0, 1, 1], [], []>} : vector<2x32xf32>, vector<32x128xf32>, vector<2x128xf32> -> vector<2x128xf32>
    %cst_73 = arith.constant dense<0.000000e+00> : vector<2x128xf32>
    %301 = tpu.matmul %274, %2, %cst_73 {dimension_numbers = #tpu.dot_dimension_numbers<[1], [0], [0], [1], [0, 0, 1, 1], [], []>} : vector<2x32xf32>, vector<32x128xf32>, vector<2x128xf32> -> vector<2x128xf32>
    %302 = arith.addf %300, %301 : vector<2x128xf32>
    %303 = vector.broadcast %3 : vector<1x128xf32> to vector<2x128xf32>
    %304 = arith.addf %302, %303 : vector<2x128xf32>
    %305 = vector.broadcast %12 : vector<1x128xf32> to vector<2x128xf32>
    %306 = arith.mulf %305, %304 : vector<2x128xf32>
    %307 = math.tanh %306 : vector<2x128xf32>
    %308 = vector.broadcast %15 : vector<1x128xf32> to vector<2x128xf32>
    %309 = arith.mulf %308, %307 : vector<2x128xf32>
    %310 = vector.broadcast %18 : vector<1x128xf32> to vector<2x128xf32>
    %311 = arith.addf %309, %310 : vector<2x128xf32>
    %312 = vector.extract_strided_slice %311 {offsets = [0, 0], sizes = [2, 32], strides = [1, 1]} : vector<2x128xf32> to vector<2x32xf32>
    %313 = vector.extract_strided_slice %311 {offsets = [0, 32], sizes = [2, 32], strides = [1, 1]} : vector<2x128xf32> to vector<2x32xf32>
    %314 = vector.extract_strided_slice %311 {offsets = [0, 64], sizes = [2, 32], strides = [1, 1]} : vector<2x128xf32> to vector<2x32xf32>
    %315 = vector.extract_strided_slice %311 {offsets = [0, 96], sizes = [2, 32], strides = [1, 1]} : vector<2x128xf32> to vector<2x32xf32>
    %316 = arith.mulf %313, %272 : vector<2x32xf32>
    %317 = arith.mulf %312, %314 : vector<2x32xf32>
    %318 = arith.addf %316, %317 : vector<2x32xf32>
    %319 = math.tanh %318 : vector<2x32xf32>
    %320 = arith.mulf %315, %319 : vector<2x32xf32>
    %c5_74 = arith.constant 5 : index
    %c0_75 = arith.constant 0 : index
    %c0_76 = arith.constant 0 : index
    %321 = vector.load %arg7[%c5_74, %c0_75, %c0_76] : memref<8x2x1xf32, #tpu.memory_space<vmem>>, vector<1x2x1xf32>
    %322 = vector.shape_cast %321 : vector<1x2x1xf32> to vector<2x1xf32>
    %323 = vector.broadcast %322 : vector<2x1xf32> to vector<2x32xf32>
    %324 = arith.mulf %320, %323 : vector<2x32xf32>
    %325 = arith.maximumf %279, %324 : vector<2x32xf32>
    %c7 = arith.constant 7 : index
    %c0_77 = arith.constant 0 : index
    %c0_78 = arith.constant 0 : index
    %326 = vector.load %arg11[%c7, %c0_77, %c0_78] : memref<8x2x128xf32, #tpu.memory_space<vmem>>, vector<1x2x128xf32>
    %327 = vector.shape_cast %326 : vector<1x2x128xf32> to vector<2x128xf32>
    %cst_79 = arith.constant dense<0.000000e+00> : vector<2x128xf32>
    %328 = tpu.matmul %299, %0, %cst_79 {dimension_numbers = #tpu.dot_dimension_numbers<[1], [0], [0], [1], [0, 0, 1, 1], [], []>} : vector<2x32xf32>, vector<32x128xf32>, vector<2x128xf32> -> vector<2x128xf32>
    %329 = arith.addf %327, %328 : vector<2x128xf32>
    %330 = vector.broadcast %12 : vector<1x128xf32> to vector<2x128xf32>
    %331 = arith.mulf %330, %329 : vector<2x128xf32>
    %332 = math.tanh %331 : vector<2x128xf32>
    %333 = vector.broadcast %15 : vector<1x128xf32> to vector<2x128xf32>
    %334 = arith.mulf %333, %332 : vector<2x128xf32>
    %335 = vector.broadcast %18 : vector<1x128xf32> to vector<2x128xf32>
    %336 = arith.addf %334, %335 : vector<2x128xf32>
    %337 = vector.extract_strided_slice %336 {offsets = [0, 0], sizes = [2, 32], strides = [1, 1]} : vector<2x128xf32> to vector<2x32xf32>
    %338 = vector.extract_strided_slice %336 {offsets = [0, 32], sizes = [2, 32], strides = [1, 1]} : vector<2x128xf32> to vector<2x32xf32>
    %339 = vector.extract_strided_slice %336 {offsets = [0, 64], sizes = [2, 32], strides = [1, 1]} : vector<2x128xf32> to vector<2x32xf32>
    %340 = vector.extract_strided_slice %336 {offsets = [0, 96], sizes = [2, 32], strides = [1, 1]} : vector<2x128xf32> to vector<2x32xf32>
    %341 = arith.mulf %338, %297 : vector<2x32xf32>
    %342 = arith.mulf %337, %339 : vector<2x32xf32>
    %343 = arith.addf %341, %342 : vector<2x32xf32>
    %344 = math.tanh %343 : vector<2x32xf32>
    %345 = arith.mulf %340, %344 : vector<2x32xf32>
    %cst_80 = arith.constant dense<0.000000e+00> : vector<2x128xf32>
    %346 = tpu.matmul %299, %1, %cst_80 {dimension_numbers = #tpu.dot_dimension_numbers<[1], [0], [0], [1], [0, 0, 1, 1], [], []>} : vector<2x32xf32>, vector<32x128xf32>, vector<2x128xf32> -> vector<2x128xf32>
    %cst_81 = arith.constant dense<0.000000e+00> : vector<2x128xf32>
    %347 = tpu.matmul %320, %2, %cst_81 {dimension_numbers = #tpu.dot_dimension_numbers<[1], [0], [0], [1], [0, 0, 1, 1], [], []>} : vector<2x32xf32>, vector<32x128xf32>, vector<2x128xf32> -> vector<2x128xf32>
    %348 = arith.addf %346, %347 : vector<2x128xf32>
    %349 = vector.broadcast %3 : vector<1x128xf32> to vector<2x128xf32>
    %350 = arith.addf %348, %349 : vector<2x128xf32>
    %351 = vector.broadcast %12 : vector<1x128xf32> to vector<2x128xf32>
    %352 = arith.mulf %351, %350 : vector<2x128xf32>
    %353 = math.tanh %352 : vector<2x128xf32>
    %354 = vector.broadcast %15 : vector<1x128xf32> to vector<2x128xf32>
    %355 = arith.mulf %354, %353 : vector<2x128xf32>
    %356 = vector.broadcast %18 : vector<1x128xf32> to vector<2x128xf32>
    %357 = arith.addf %355, %356 : vector<2x128xf32>
    %358 = vector.extract_strided_slice %357 {offsets = [0, 0], sizes = [2, 32], strides = [1, 1]} : vector<2x128xf32> to vector<2x32xf32>
    %359 = vector.extract_strided_slice %357 {offsets = [0, 32], sizes = [2, 32], strides = [1, 1]} : vector<2x128xf32> to vector<2x32xf32>
    %360 = vector.extract_strided_slice %357 {offsets = [0, 64], sizes = [2, 32], strides = [1, 1]} : vector<2x128xf32> to vector<2x32xf32>
    %361 = vector.extract_strided_slice %357 {offsets = [0, 96], sizes = [2, 32], strides = [1, 1]} : vector<2x128xf32> to vector<2x32xf32>
    %362 = arith.mulf %359, %318 : vector<2x32xf32>
    %363 = arith.mulf %358, %360 : vector<2x32xf32>
    %364 = arith.addf %362, %363 : vector<2x32xf32>
    %365 = math.tanh %364 : vector<2x32xf32>
    %366 = arith.mulf %361, %365 : vector<2x32xf32>
    %c6_82 = arith.constant 6 : index
    %c0_83 = arith.constant 0 : index
    %c0_84 = arith.constant 0 : index
    %367 = vector.load %arg7[%c6_82, %c0_83, %c0_84] : memref<8x2x1xf32, #tpu.memory_space<vmem>>, vector<1x2x1xf32>
    %368 = vector.shape_cast %367 : vector<1x2x1xf32> to vector<2x1xf32>
    %369 = vector.broadcast %368 : vector<2x1xf32> to vector<2x32xf32>
    %370 = arith.mulf %366, %369 : vector<2x32xf32>
    %371 = arith.maximumf %325, %370 : vector<2x32xf32>
    %cst_85 = arith.constant dense<0.000000e+00> : vector<2x128xf32>
    %372 = tpu.matmul %345, %1, %cst_85 {dimension_numbers = #tpu.dot_dimension_numbers<[1], [0], [0], [1], [0, 0, 1, 1], [], []>} : vector<2x32xf32>, vector<32x128xf32>, vector<2x128xf32> -> vector<2x128xf32>
    %cst_86 = arith.constant dense<0.000000e+00> : vector<2x128xf32>
    %373 = tpu.matmul %366, %2, %cst_86 {dimension_numbers = #tpu.dot_dimension_numbers<[1], [0], [0], [1], [0, 0, 1, 1], [], []>} : vector<2x32xf32>, vector<32x128xf32>, vector<2x128xf32> -> vector<2x128xf32>
    %374 = arith.addf %372, %373 : vector<2x128xf32>
    %375 = vector.broadcast %3 : vector<1x128xf32> to vector<2x128xf32>
    %376 = arith.addf %374, %375 : vector<2x128xf32>
    %377 = vector.broadcast %12 : vector<1x128xf32> to vector<2x128xf32>
    %378 = arith.mulf %377, %376 : vector<2x128xf32>
    %379 = math.tanh %378 : vector<2x128xf32>
    %380 = vector.broadcast %15 : vector<1x128xf32> to vector<2x128xf32>
    %381 = arith.mulf %380, %379 : vector<2x128xf32>
    %382 = vector.broadcast %18 : vector<1x128xf32> to vector<2x128xf32>
    %383 = arith.addf %381, %382 : vector<2x128xf32>
    %384 = vector.extract_strided_slice %383 {offsets = [0, 0], sizes = [2, 32], strides = [1, 1]} : vector<2x128xf32> to vector<2x32xf32>
    %385 = vector.extract_strided_slice %383 {offsets = [0, 32], sizes = [2, 32], strides = [1, 1]} : vector<2x128xf32> to vector<2x32xf32>
    %386 = vector.extract_strided_slice %383 {offsets = [0, 64], sizes = [2, 32], strides = [1, 1]} : vector<2x128xf32> to vector<2x32xf32>
    %387 = vector.extract_strided_slice %383 {offsets = [0, 96], sizes = [2, 32], strides = [1, 1]} : vector<2x128xf32> to vector<2x32xf32>
    %388 = arith.mulf %385, %364 : vector<2x32xf32>
    %389 = arith.mulf %384, %386 : vector<2x32xf32>
    %390 = arith.addf %388, %389 : vector<2x32xf32>
    %391 = math.tanh %390 : vector<2x32xf32>
    %392 = arith.mulf %387, %391 : vector<2x32xf32>
    %c7_87 = arith.constant 7 : index
    %c0_88 = arith.constant 0 : index
    %c0_89 = arith.constant 0 : index
    %393 = vector.load %arg7[%c7_87, %c0_88, %c0_89] : memref<8x2x1xf32, #tpu.memory_space<vmem>>, vector<1x2x1xf32>
    %394 = vector.shape_cast %393 : vector<1x2x1xf32> to vector<2x1xf32>
    %395 = vector.broadcast %394 : vector<2x1xf32> to vector<2x32xf32>
    %396 = arith.mulf %392, %395 : vector<2x32xf32>
    %397 = arith.maximumf %371, %396 : vector<2x32xf32>
    %c0_90 = arith.constant 0 : index
    %c0_91 = arith.constant 0 : index
    %398 = vector.load %arg8[%c0_90, %c0_91] : memref<32x5xf32, #tpu.memory_space<vmem>>, vector<32x5xf32>
    %cst_92 = arith.constant dense<0.000000e+00> : vector<2x5xf32>
    %399 = tpu.matmul %397, %398, %cst_92 {dimension_numbers = #tpu.dot_dimension_numbers<[1], [0], [0], [1], [0, 0, 1, 1], [], []>} : vector<2x32xf32>, vector<32x5xf32>, vector<2x5xf32> -> vector<2x5xf32>
    %c0_93 = arith.constant 0 : index
    %c0_94 = arith.constant 0 : index
    %400 = vector.load %arg9[%c0_93, %c0_94] : memref<1x5xf32, #tpu.memory_space<vmem>>, vector<1x5xf32>
    %401 = vector.broadcast %400 : vector<1x5xf32> to vector<2x5xf32>
    %402 = arith.addf %399, %401 : vector<2x5xf32>
    %c0_95 = arith.constant 0 : index
    %c0_96 = arith.constant 0 : index
    %403 = vector.load %arg10[%c0_95, %c0_96] : memref<2x5xf32, #tpu.memory_space<vmem>>, vector<2x5xf32>
    tpu.vector_store %arg10[%c0_95, %c0_96], %402 {strides = array<i32>} : memref<2x5xf32, #tpu.memory_space<vmem>>, vector<2x5xf32>,
    return
  }
}

</mosaic_0001>

<bundles_post_ra>
// kernel: model_forward.1
= control target key start
LH: loop header
LB: loop body
LE: loop exit
PB: predicated region body
PF: predicated region fallthrough
CT: control target
= control target key end

     0   :  { %15 = vsyncpa [#allocation4], 0  ;;  %s1862_s0 = inlined_call_operand.vmem [shape: f32[8,2,4], index: 0, kind: input, shape index: {}]   ;;  %s1863_s1 = inlined_call_operand.vmem [shape: f32[4,128], index: 1, kind: input, shape index: {}]   ;;  %s1864_s2 = inlined_call_operand.vmem [shape: f32[32,128], index: 2, kind: input, shape index: {}]   ;;  %s1865_s3 = inlined_call_operand.vmem [shape: f32[1,128], index: 3, kind: input, shape index: {}]   ;;  %s1866_s4 = inlined_call_operand.vmem [shape: f32[32,128], index: 4, kind: input, shape index: {}]   ;;  %s1867_s5 = inlined_call_operand.hbm [shape: f32[32,128], index: 5, kind: input, shape index: {}]   ;;  %s1868_s6 = inlined_call_operand.vmem [shape: f32[1,128], index: 6, kind: input, shape index: {}]   ;;  %s1869_s7 = inlined_call_operand.vmem [shape: f32[8,2,1], index: 7, kind: input, shape index: {}]   ;;  %s1870_s8 = inlined_call_operand.vmem [shape: f32[32,5], index: 8, kind: input, shape index: {}]   ;;  %s1871_s9 = inlined_call_operand.vmem [shape: f32[1,5], index: 9, kind: input, shape index: {}]   ;;  %s1872_s10 = inlined_call_operand.hbm [shape: f32[2,5], index: 10, kind: output, shape index: {}]  }
   0x1   :  { %16 = vsyncpa [#allocation5], 0  ;;  %s31_s15 = sshll.u32 %s1867_s5, 4  ;;  %s1379_s16 = smov [#allocation3]   ;;  %s32_s15 = int_to_ptr.hbm [resolvable:$true] %s31_s15 }
   0x2   :  { %s33_s17 = sshll.u32 %s1379_s16, 4  ;;  %s1380_s18 = smov 128   ;;  %s34_s17 = int_to_ptr.vmem [resolvable:$true] %s33_s17 }
   0x3   :  { %s1381_s19 = smov 8  }
   0x4   :  { %39 = dma.hbm_to_vmem [thread:$0]  %s32_s15, 512, %s34_s17, [#allocation4], %s1380_s18, %s1380_s18, %s1381_s19  }
   0x5   :  { %1375 = dma.done.wait [#allocation4], 512  }
   0x6   :  { %1376 = vsyncadd [#allocation4], 4294966784  ;;  %vm115_vm0 = vcmask 1043456   ;;  %v80_v0 = vld [vmem:[%s1863_s1] sm:$0xf]  ;;  %v1464_v5 = vld [vmem:[%s1864_s2 + $0x18] sm:$0xff]  ;;  %v65_v11 = vlaneseq }
   0x7   :  { %v72_v1 = vld [vmem:[%s1862_s0] sm:$0x3]  ;;  %v73_v2 = vld [vmem:[%s1862_s0 + $0x2] sm:$0x3]  ;;  %1215 = vmatpush.msk.msra.mxu0 %vm115_vm0, %v80_v0  ;;  %v74_v3 = vld [vmem:[%s1862_s0 + $0x4] sm:$0x3]  ;;  %181 = vmatpush.msra.mxu1 %v1464_v5 }
   0x8   :  { %v75_v4 = vld [vmem:[%s1862_s0 + $0x6] sm:$0x3]  ;;  %93 = vst [vmem:[#allocation1] ss:$4 sm:$0xff] %v72_v1  ;;  %v1469_v6 = vld [vmem:[%s1864_s2 + $0x10] sm:$0xff]  ;;  %230 = vmatpush.msra.mxu2 %v1464_v5  ;;  %v1476_v7 = vld [vmem:[%s1864_s2 + $0x8] sm:$0xff] }
   0x9   :  { %95 = vst [vmem:[#allocation1 + $0x1] ss:$4 sm:$0xff] %v73_v2  ;;  %182 = vmatpush.msra.mxu1 %v1469_v6  ;;  %v1483_v8 = vld [vmem:[%s1864_s2] sm:$0xff]  ;;  %vm110_vm1 = vcmask 31744   ;;  %v1382_v9 = vmov 0.0   ;;  %v66_v14 = vand.u32 127, %v65_v11 }
   0xa   :  { %97 = vst [vmem:[#allocation1 + $0x2] ss:$4 sm:$0xff] %v74_v3  ;;  %231 = vmatpush.msra.mxu2 %v1469_v6  ;;  %v1498_v12 = vld [vmem:[%s1865_s3] ss:$0 sm:$0xff]  ;;  %v1383_v20 = vmov 0.5   ;;  %s1384_s3 = smov 64  }
   0xb   :  { %99 = vst [vmem:[#allocation1 + $0x3] ss:$4 sm:$0xff] %v75_v4  ;;  %183 = vmatpush.msra.mxu1 %v1476_v7  ;;  %vm67_vm2 = vcmp.ge.s32.totalorder %v66_v14, 64  ;;  %vm68_vm3 = vcmp.lt.s32.totalorder %v66_v14, 96  ;;  %s1385_s17 = smov 32   ;;  %v1514_v35 = vld [vmem:[#allocation3 + $0x18] sm:$0xff] }
   0xc   :  { %232 = vmatpush.msra.mxu2 %v1476_v7  ;;  %vm69_vm4 = vmand %vm67_vm2, %vm68_vm3  ;;  %v1516_v36 = vld [vmem:[#allocation3 + $0x10] sm:$0xff]  ;;  %272 = vmatpush.msra.mxu3 %v1514_v35  ;;  %v1522_v37 = vld [vmem:[%s1866_s4 + $0x18] sm:$0xff]  ;;  %vm165_vm5 = vcmask 261120   ;;  %s1387_s30 = smov [#allocation6]   ;;  %s1205_s13 = sshll.u32 %s1872_s10, 4  ;;  %vm1196_vm6 = vcmask 33792   ;;  %s1206_s13 = int_to_ptr.hbm [resolvable:$true] %s1205_s13 }
   0xd   :  { %184 = vmatpush.msra.mxu1 %v1483_v8  ;;  %v1501_v21 = vsel %vm69_vm4, 1.0, %v1383_v20  ;;  %v1504_v26 = vsel %vm69_vm4, 0.0, %v1383_v20  ;;  %v1527_v38 = vld [vmem:[%s1866_s4 + $0x10] sm:$0xff]  ;;  %v1529_v39 = vld [vmem:[#allocation3 + $0x8] sm:$0xff]  ;;  %418 = vmatpush.msrb.mxu0 %v1522_v37  ;;  %v1537_v40 = vld [vmem:[%s1866_s4 + $0x8] sm:$0xff]  ;;  %s1203_s11 = sshll.u32 %s1387_s30, 4  ;;  %s1204_s11 = int_to_ptr.vmem [resolvable:$true] %s1203_s11 }
   0xe   :  { %233 = vmatpush.msra.mxu2 %v1483_v8  ;;  %185 = vmatmul.f32.vlgmr.msra.gmra.mxu1 %v1382_v9  ;;  %v1539_v41 = vld [vmem:[#allocation3] sm:$0xff]  ;;  %v1547_v42 = vld [vmem:[%s1866_s4] sm:$0xff]  ;;  %v77_v20 = vld [vmem:[%s1862_s0 + $0xa] sm:$0x3] }
   0xf   :  { %292 = vmatpush.msrb.mxu1 %v1522_v37  ;;  %273 = vmatpush.msra.mxu3 %v1516_v36  ;;  %v1585_v47 = vld [vmem:[%s1868_s6] ss:$0 sm:$0xff]  ;;  %103 = vst [vmem:[#allocation1 + $0x21] ss:$4 sm:$0xff] %v77_v20 }
  0x10   :  { %351 = vmatpush.msrb.mxu2 %v1464_v5  ;;  %419 = vmatpush.msrb.mxu0 %v1527_v38 }
  0x11   :  { %293 = vmatpush.msrb.mxu1 %v1527_v38  ;;  %274 = vmatpush.msra.mxu3 %v1529_v39 }
  0x12   :  { %v108_v10 = vld.sshfl [vmem:[#allocation1] sm:$0xff pattern:$0x73625140]  ;;  %352 = vmatpush.msrb.mxu2 %v1469_v6  ;;  %420 = vmatpush.msrb.mxu0 %v1537_v40 }
  0x13   :  { %1216 = vmatmul.msk.f32.vlgmr.msra.gmra.mxu0 %vm110_vm1, %v108_v10  ;;  %294 = vmatpush.msrb.mxu1 %v1537_v40 }
  0x14   :  { %353 = vmatpush.msrb.mxu2 %v1476_v7  ;;  %275 = vmatpush.msra.mxu3 %v1539_v41 }
  0x15   :  { %276 = vmatmul.f32.vlgmr.msra.gmra.mxu3 %v1382_v9  ;;  %295 = vmatpush.msrb.mxu1 %v1547_v42 }
  0x16   :  { %354 = vmatpush.msrb.mxu2 %v1483_v8  ;;  %398 = vmatpush.msrb.mxu3 %v1514_v35 }
  0x17   :  { %421 = vmatpush.msrb.mxu0 %v1547_v42  ;;  %476 = vmatpush.msra.mxu1 %v1464_v5 }
  0x18   :  { %399 = vmatpush.msrb.mxu3 %v1516_v36 }
  0x19   :  { %601 = vmatpush.msra.mxu0 %v1464_v5  ;;  %477 = vmatpush.msra.mxu1 %v1469_v6 }
  0x1a   :  { %400 = vmatpush.msrb.mxu3 %v1529_v39 }
  0x1b   :  { %602 = vmatpush.msra.mxu0 %v1469_v6  ;;  %478 = vmatpush.msra.mxu1 %v1476_v7 }
  0x1c   :  { %401 = vmatpush.msrb.mxu3 %v1539_v41 }
  0x1d   :  { %603 = vmatpush.msra.mxu0 %v1476_v7  ;;  %479 = vmatpush.msra.mxu1 %v1483_v8 }
  0x1e   :  { %543 = vmatpush.msra.mxu3 %v1522_v37 }
  0x1f   :  { %604 = vmatpush.msra.mxu0 %v1483_v8 }
  0x20   :  { %544 = vmatpush.msra.mxu3 %v1527_v38 }
  0x22   :  { %545 = vmatpush.msra.mxu3 %v1537_v40 }
  0x24   :  { %546 = vmatpush.msra.mxu3 %v1547_v42 }
  0x8b   :  { %v186_v19 = vpop.f32.mrf.mxu1 }
  0x90   :  { %v136_v13 = vpop.f32.mrf.mxu0 }
  0x91   :  { %v137_v15 = vadd.f32 %v1498_v12, %v136_v13 }
  0x93   :  { %v144_v16 = vrot.slane %v137_v15, 2  ;;  %v145_v17 = vrot.slane %v137_v15, 4  ;;  %v146_v18 = vrot.slane %v137_v15, 6  ;;  %156 = vst [vmem:[#allocation2] sm:$0x3] %v137_v15 }
  0x95   :  { %157 = vst [vmem:[#allocation2 + $0x2] sm:$0x3] %v144_v16 }
  0x96   :  { %158 = vst [vmem:[#allocation2 + $0x4] sm:$0x3] %v145_v17 }
  0x97   :  { %159 = vst [vmem:[#allocation2 + $0x6] sm:$0x3] %v146_v18 }
  0x98   :  { %v277_v46 = vpop.f32.mrf.mxu3 }
  0x9a   :  { %v164_v22 = vld [vmem:[#allocation2] sm:$0x3] }
  0x9b   :  { %v189_v23 = vadd.f32 %v186_v19, %v164_v22  ;;  %v76_v19 = vld [vmem:[%s1862_s0 + $0x8] sm:$0x3]  ;;  %v78_v22 = vld [vmem:[%s1862_s0 + $0xc] sm:$0x3] }
  0x9c   :  { %v212_v52 = vld [vmem:[#allocation2 + $0x2] sm:$0x3]  ;;  %101 = vst [vmem:[#allocation1 + $0x20] ss:$4 sm:$0xff] %v76_v19 }
  0x9d   :  { %v190_v24 = vmul.f32 %v189_v23, %v1501_v21  ;;  %v79_v23 = vld [vmem:[%s1862_s0 + $0xe] sm:$0x3]  ;;  %105 = vst [vmem:[#allocation1 + $0x22] ss:$4 sm:$0xff] %v78_v22 }
  0x9e   :  { %107 = vst [vmem:[#allocation1 + $0x23] ss:$4 sm:$0xff] %v79_v23 }
  0x9f   :  { %1263 = vtanh.f32 %v190_v24 }
  0xa5   :  { %v1264_v25 = vpop.eup %1263  ;;  %v109_v24 = vld.sshfl [vmem:[#allocation1 + $0x20] sm:$0xff pattern:$0x73625140] }
  0xa6   :  { %v192_v27 = vmul.f32 %v1264_v25, %v1501_v21  ;;  %1217 = vmatmul.msk.f32.gmra.mxu0 %vm110_vm1, %v109_v24 }
  0xa8   :  { %v193_v28 = vadd.f32 %v192_v27, %v1504_v26 }
  0xaa   :  { %196 = vrot.lane.b32.xlu0 %v193_v28, %s1384_s3  ;;  %v194_v31 = vmul.f32 0.0, %v193_v28 }
 0x11c   :  { %v197_v29 = vpop.permute.xlu0 %196 }
 0x11d   :  { %v199_v30 = vmul.f32 %v197_v29, %v193_v28 }
 0x11f   :  { %201 = vrot.lane.b32.xlu0 %v199_v30, %s1385_s17 }
 0x191   :  { %v202_v32 = vpop.permute.xlu0 %201 }
 0x192   :  { %v1510_v33 = vadd.f32 %v202_v32, %v194_v31 }
 0x194   :  { %1265 = vtanh.f32 %v1510_v33 }
 0x19a   :  { %v1266_v34 = vpop.eup %1265 }
 0x19b   :  { %207 = vrot.lane.b32.xlu1 %v1266_v34, %s1384_s3 }
 0x20d   :  { %v208_v43 = vpop.permute.xlu1 %207 }
 0x20e   :  { %v210_v44 = vmul.f32 %v208_v43, %v193_v28  ;;  %v139_v28 = vpop.f32.mrf.mxu0 }
 0x20f   :  { %v140_v29 = vadd.f32 %v1498_v12, %v139_v28 }
 0x210   :  { %214 = vrot.lane.b32.xlu1 %v210_v44, %s1385_s17 }
 0x211   :  { %v147_v30 = vrot.slane %v140_v29, 2  ;;  %v148_v31 = vrot.slane %v140_v29, 4  ;;  %v149_v32 = vrot.slane %v140_v29, 6  ;;  %160 = vst [vmem:[#allocation2 + $0x8] sm:$0x3] %v140_v29 }
 0x213   :  { %161 = vst [vmem:[#allocation2 + $0xa] sm:$0x3] %v147_v30 }
 0x214   :  { %162 = vst [vmem:[#allocation2 + $0xc] sm:$0x3] %v148_v31 }
 0x215   :  { %163 = vst [vmem:[#allocation2 + $0xe] sm:$0x3] %v149_v32 }
 0x282   :  { %v215_v45 = vpop.permute.xlu1 %214 }
 0x283   :  { %1218 = vmatmul.msk.f32.vlgmr.msra.gmra.mxu2 %vm165_vm5, %v215_v45  ;;  %1219 = vmatmul.msk.f32.vlgmr.msrb.gmra.mxu1 %vm165_vm5, %v215_v45 }
 0x284   :  { %523 = vmatpush.msra.mxu2 %v1514_v35  ;;  %648 = vmatpush.msrb.mxu1 %v1514_v35 }
 0x286   :  { %524 = vmatpush.msra.mxu2 %v1516_v36  ;;  %649 = vmatpush.msrb.mxu1 %v1516_v36 }
 0x288   :  { %525 = vmatpush.msra.mxu2 %v1529_v39  ;;  %650 = vmatpush.msrb.mxu1 %v1529_v39 }
 0x28a   :  { %526 = vmatpush.msra.mxu2 %v1539_v41  ;;  %651 = vmatpush.msrb.mxu1 %v1539_v41 }
 0x300   :  { %v297_v48 = vpop.f32.mrf.mxu1 }
 0x301   :  { %v298_v49 = vadd.f32 %v297_v48, %v277_v46  ;;  %v333_v46 = vld [vmem:[#allocation2 + $0x4] sm:$0x3] }
 0x303   :  { %v303_v50 = vadd.f32 %v1585_v47, %v298_v49 }
 0x305   :  { %v304_v51 = vmul.f32 %v303_v50, %v1501_v21 }
 0x306   :  { %v235_v53 = vpop.f32.mrf.mxu2 }
 0x307   :  { %1267 = vtanh.f32 %v304_v51  ;;  %v238_v54 = vadd.f32 %v235_v53, %v212_v52 }
 0x309   :  { %v239_v55 = vmul.f32 %v238_v54, %v1501_v21 }
 0x30b   :  { %1269 = vtanh.f32 %v239_v55 }
 0x30d   :  { %v1268_v56 = vpop.eup %1267 }
 0x30e   :  { %v306_v57 = vmul.f32 %v1268_v56, %v1501_v21 }
 0x310   :  { %v307_v58 = vadd.f32 %v306_v57, %v1504_v26 }
 0x311   :  { %v1270_v59 = vpop.eup %1269 }
 0x312   :  { %310 = vrot.lane.b32.xlu2 %v307_v58, %s1384_s3  ;;  %v241_v60 = vmul.f32 %v1270_v59, %v1501_v21  ;;  %v308_v2 = vmul.f32 0.0, %v307_v58 }
 0x314   :  { %v242_v61 = vadd.f32 %v241_v60, %v1504_v26 }
 0x316   :  { %v243_v9 = vmul.f32 %v242_v61, %v1510_v33 }
 0x31a   :  { %245 = vrot.lane.b32.xlu2 %v242_v61, %s1384_s3 }
 0x36c   :  { %v311_v62 = vpop.permute.xlu2 %310 }
 0x36d   :  { %v313_v63 = vmul.f32 %v311_v62, %v307_v58 }
 0x36f   :  { %315 = vrot.lane.b32.xlu0 %v313_v63, %s1385_s17 }
 0x374   :  { %v246_v0 = vpop.permute.xlu2 %245 }
 0x375   :  { %v248_v1 = vmul.f32 %v246_v0, %v242_v61 }
 0x377   :  { %250 = vrot.lane.b32.xlu1 %v248_v1, %s1385_s17 }
 0x3e1   :  { %v316_v3 = vpop.permute.xlu0 %315 }
 0x3e2   :  { %v1598_v4 = vadd.f32 %v316_v3, %v308_v2 }
 0x3e4   :  { %1271 = vtanh.f32 %v1598_v4 }
 0x3e9   :  { %v251_v10 = vpop.permute.xlu1 %250 }
 0x3ea   :  { %v1272_v11 = vpop.eup %1271  ;;  %v1602_v13 = vadd.f32 %v251_v10, %v243_v9 }
 0x3eb   :  { %321 = vrot.lane.b32.xlu2 %v1272_v11, %s1384_s3 }
 0x3ec   :  { %1273 = vtanh.f32 %v1602_v13 }
 0x3f2   :  { %v1274_v14 = vpop.eup %1273 }
 0x3f3   :  { %256 = vrot.lane.b32.xlu0 %v1274_v14, %s1384_s3 }
 0x445   :  { %v322_v15 = vpop.permute.xlu2 %321 }
 0x446   :  { %v1607_v16 = vmul.f32 %v322_v15, %v307_v58  ;;  %v458_v15 = vld [vmem:[#allocation2 + $0x6] sm:$0x3] }
 0x448   :  { %382 = vrot.lane.b32.xlu1 %v1607_v16, %s1385_s17 }
 0x465   :  { %v257_v17 = vpop.permute.xlu0 %256 }
 0x466   :  { %v259_v18 = vmul.f32 %v257_v17, %v242_v61 }
 0x468   :  { %335 = vrot.lane.b32.xlu2 %v259_v18, %s1385_s17 }
 0x4ba   :  { %v383_v25 = vpop.permute.xlu1 %382 }
 0x4bb   :  { %1221 = vmatmul.msk.f32.vlgmr.msrb.gmra.mxu3 %vm165_vm5, %v383_v25 }
 0x4bc   :  { %726 = vmatpush.msrb.mxu3 %v1464_v5 }
 0x4be   :  { %727 = vmatpush.msrb.mxu3 %v1469_v6 }
 0x4c0   :  { %728 = vmatpush.msrb.mxu3 %v1476_v7 }
 0x4c2   :  { %v336_v27 = vpop.permute.xlu2 %335  ;;  %729 = vmatpush.msrb.mxu3 %v1483_v8 }
 0x4c3   :  { %1220 = vmatmul.msk.f32.vlgmr.msrb.gmra.mxu2 %vm165_vm5, %v336_v27  ;;  %1222 = vmatmul.msk.f32.vlgmr.msrb.gmra.mxu0 %vm165_vm5, %v336_v27 }
 0x4c4   :  { %668 = vmatpush.msrb.mxu2 %v1522_v37  ;;  %773 = vmatpush.msrb.mxu0 %v1514_v35 }
 0x4c6   :  { %669 = vmatpush.msrb.mxu2 %v1527_v38  ;;  %774 = vmatpush.msrb.mxu0 %v1516_v36 }
 0x4c8   :  { %670 = vmatpush.msrb.mxu2 %v1537_v40  ;;  %775 = vmatpush.msrb.mxu0 %v1529_v39 }
 0x4ca   :  { %671 = vmatpush.msrb.mxu2 %v1547_v42  ;;  %776 = vmatpush.msrb.mxu0 %v1539_v41 }
 0x53e   :  { %v403_v33 = vpop.f32.mrf.mxu3 }
 0x540   :  { %v423_v34 = vpop.f32.mrf.mxu0 }
 0x541   :  { %v424_v43 = vadd.f32 %v423_v34, %v403_v33 }
 0x543   :  { %v426_v44 = vadd.f32 %v1585_v47, %v424_v43 }
 0x545   :  { %v427_v45 = vmul.f32 %v426_v44, %v1501_v21 }
 0x546   :  { %v356_v48 = vpop.f32.mrf.mxu2 }
 0x547   :  { %1275 = vtanh.f32 %v427_v45  ;;  %v359_v49 = vadd.f32 %v356_v48, %v333_v46 }
 0x549   :  { %v360_v12 = vmul.f32 %v359_v49, %v1501_v21 }
 0x54b   :  { %1277 = vtanh.f32 %v360_v12 }
 0x54d   :  { %v1276_v50 = vpop.eup %1275 }
 0x54e   :  { %v429_v51 = vmul.f32 %v1276_v50, %v1501_v21 }
 0x550   :  { %v430_v52 = vadd.f32 %v429_v51, %v1504_v26 }
 0x551   :  { %v1278_v53 = vpop.eup %1277 }
 0x552   :  { %433 = vrot.lane.b32.xlu1 %v430_v52, %s1384_s3  ;;  %v362_v54 = vmul.f32 %v1278_v53, %v1501_v21  ;;  %v431_v0 = vmul.f32 %v430_v52, %v1598_v4 }
 0x554   :  { %v363_v55 = vadd.f32 %v362_v54, %v1504_v26 }
 0x556   :  { %366 = vrot.lane.b32.xlu0 %v363_v55, %s1384_s3  ;;  %v364_v60 = vmul.f32 %v363_v55, %v1602_v13 }
 0x5c4   :  { %v434_v56 = vpop.permute.xlu1 %433 }
 0x5c5   :  { %v436_v57 = vmul.f32 %v434_v56, %v430_v52 }
 0x5c7   :  { %438 = vrot.lane.b32.xlu0 %v436_v57, %s1385_s17 }
 0x5c8   :  { %v367_v58 = vpop.permute.xlu0 %366 }
 0x5c9   :  { %v369_v59 = vmul.f32 %v367_v58, %v363_v55 }
 0x5cb   :  { %371 = vrot.lane.b32.xlu2 %v369_v59, %s1385_s17  ;;  %v583_v59 = vld [vmem:[#allocation2 + $0x8] sm:$0x3] }
 0x625   :  { %v372_v61 = vpop.permute.xlu2 %371 }
 0x626   :  { %v374_v62 = vadd.f32 %v372_v61, %v364_v60 }
 0x628   :  { %1279 = vtanh.f32 %v374_v62 }
 0x62e   :  { %v1280_v63 = vpop.eup %1279 }
 0x62f   :  { %377 = vrot.lane.b32.xlu1 %v1280_v63, %s1384_s3 }
 0x639   :  { %v439_v1 = vpop.permute.xlu0 %438 }
 0x63a   :  { %v441_v2 = vadd.f32 %v439_v1, %v431_v0 }
 0x63c   :  { %1281 = vtanh.f32 %v441_v2 }
 0x642   :  { %v1282_v3 = vpop.eup %1281 }
 0x643   :  { %444 = vrot.lane.b32.xlu2 %v1282_v3, %s1384_s3 }
 0x69d   :  { %v445_v9 = vpop.permute.xlu2 %444 }
 0x69e   :  { %v1656_v10 = vmul.f32 %v445_v9, %v430_v52 }
 0x6a0   :  { %507 = vrot.lane.b32.xlu1 %v1656_v10, %s1385_s17 }
 0x6a1   :  { %v378_v11 = vpop.permute.xlu1 %377 }
 0x6a2   :  { %v380_v13 = vmul.f32 %v378_v11, %v363_v55 }
 0x6a4   :  { %460 = vrot.lane.b32.xlu0 %v380_v13, %s1385_s17 }
 0x712   :  { %v508_v14 = vpop.permute.xlu1 %507 }
 0x713   :  { %1225 = vmatmul.msk.f32.vlgmr.msra.gmra.mxu2 %vm165_vm5, %v508_v14 }
 0x714   :  { %851 = vmatpush.msra.mxu2 %v1464_v5 }
 0x716   :  { %v461_v4 = vpop.permute.xlu0 %460  ;;  %852 = vmatpush.msra.mxu2 %v1469_v6 }
 0x717   :  { %1224 = vmatmul.msk.f32.vlgmr.msra.gmra.mxu1 %vm165_vm5, %v461_v4  ;;  %1226 = vmatmul.msk.f32.vlgmr.msra.gmra.mxu3 %vm165_vm5, %v461_v4 }
 0x718   :  { %793 = vmatpush.msra.mxu1 %v1522_v37  ;;  %853 = vmatpush.msra.mxu2 %v1476_v7 }
 0x719   :  { %898 = vmatpush.msra.mxu3 %v1514_v35 }
 0x71a   :  { %794 = vmatpush.msra.mxu1 %v1527_v38  ;;  %854 = vmatpush.msra.mxu2 %v1483_v8 }
 0x71b   :  { %899 = vmatpush.msra.mxu3 %v1516_v36 }
 0x71c   :  { %795 = vmatpush.msra.mxu1 %v1537_v40 }
 0x71d   :  { %900 = vmatpush.msra.mxu3 %v1529_v39 }
 0x71e   :  { %796 = vmatpush.msra.mxu1 %v1547_v42 }
 0x71f   :  { %901 = vmatpush.msra.mxu3 %v1539_v41 }
 0x794   :  { %v481_v17 = vpop.f32.mrf.mxu1 }
 0x795   :  { %v484_v18 = vadd.f32 %v481_v17, %v458_v15 }
 0x796   :  { %v528_v20 = vpop.f32.mrf.mxu2 }
 0x797   :  { %v485_v19 = vmul.f32 %v484_v18, %v1501_v21 }
 0x799   :  { %1283 = vtanh.f32 %v485_v19 }
 0x79a   :  { %v548_v22 = vpop.f32.mrf.mxu3 }
 0x79b   :  { %v549_v23 = vadd.f32 %v548_v22, %v528_v20 }
 0x79d   :  { %v551_v24 = vadd.f32 %v1585_v47, %v549_v23 }
 0x79f   :  { %v1284_v25 = vpop.eup %1283  ;;  %v552_v27 = vmul.f32 %v551_v24, %v1501_v21 }
 0x7a0   :  { %v487_v28 = vmul.f32 %v1284_v25, %v1501_v21 }
 0x7a1   :  { %1285 = vtanh.f32 %v552_v27 }
 0x7a2   :  { %v488_v29 = vadd.f32 %v487_v28, %v1504_v26 }
 0x7a4   :  { %491 = vrot.lane.b32.xlu2 %v488_v29, %s1384_s3  ;;  %v489_v45 = vmul.f32 %v488_v29, %v374_v62 }
 0x7a7   :  { %v1286_v30 = vpop.eup %1285 }
 0x7a8   :  { %v554_v31 = vmul.f32 %v1286_v30, %v1501_v21 }
 0x7aa   :  { %v555_v32 = vadd.f32 %v554_v31, %v1504_v26 }
 0x7ac   :  { %558 = vrot.lane.b32.xlu0 %v555_v32, %s1384_s3  ;;  %v556_v49 = vmul.f32 %v555_v32, %v441_v2 }
 0x7fe   :  { %v492_v33 = vpop.permute.xlu2 %491 }
 0x7ff   :  { %v494_v34 = vmul.f32 %v492_v33, %v488_v29 }
 0x801   :  { %496 = vrot.lane.b32.xlu1 %v494_v34, %s1385_s17 }
 0x81e   :  { %v559_v43 = vpop.permute.xlu0 %558 }
 0x81f   :  { %v561_v44 = vmul.f32 %v559_v43, %v555_v32 }
 0x821   :  { %563 = vrot.lane.b32.xlu2 %v561_v44, %s1385_s17 }
 0x873   :  { %v497_v46 = vpop.permute.xlu1 %496 }
 0x874   :  { %v499_v48 = vadd.f32 %v497_v46, %v489_v45 }
 0x876   :  { %1287 = vtanh.f32 %v499_v48 }
 0x87b   :  { %v564_v12 = vpop.permute.xlu2 %563 }
 0x87c   :  { %v1288_v50 = vpop.eup %1287  ;;  %v566_v51 = vadd.f32 %v564_v12, %v556_v49 }
 0x87d   :  { %502 = vrot.lane.b32.xlu0 %v1288_v50, %s1384_s3 }
 0x87e   :  { %1289 = vtanh.f32 %v566_v51 }
 0x884   :  { %v1290_v52 = vpop.eup %1289 }
 0x885   :  { %569 = vrot.lane.b32.xlu1 %v1290_v52, %s1384_s3 }
 0x8ef   :  { %v503_v53 = vpop.permute.xlu0 %502 }
 0x8f0   :  { %v505_v54 = vmul.f32 %v503_v53, %v488_v29 }
 0x8f2   :  { %585 = vrot.lane.b32.xlu2 %v505_v54, %s1385_s17 }
 0x8f7   :  { %v570_v55 = vpop.permute.xlu1 %569 }
 0x8f8   :  { %v1690_v56 = vmul.f32 %v570_v55, %v555_v32 }
 0x8fa   :  { %632 = vrot.lane.b32.xlu0 %v1690_v56, %s1385_s17 }
 0x94c   :  { %v586_v57 = vpop.permute.xlu2 %585 }
 0x94d   :  { %1228 = vmatmul.msk.f32.vlgmr.msra.gmra.mxu0 %vm165_vm5, %v586_v57  ;;  %1230 = vmatmul.msk.f32.vlgmr.msrb.gmra.mxu2 %vm165_vm5, %v586_v57 }
 0x94e   :  { %918 = vmatpush.msra.mxu0 %v1522_v37  ;;  %1023 = vmatpush.msrb.mxu2 %v1514_v35 }
 0x950   :  { %919 = vmatpush.msra.mxu0 %v1527_v38  ;;  %1024 = vmatpush.msrb.mxu2 %v1516_v36 }
 0x952   :  { %920 = vmatpush.msra.mxu0 %v1537_v40  ;;  %1025 = vmatpush.msrb.mxu2 %v1529_v39 }
 0x954   :  { %921 = vmatpush.msra.mxu0 %v1547_v42  ;;  %1026 = vmatpush.msrb.mxu2 %v1539_v41 }
 0x96c   :  { %v633_v58 = vpop.permute.xlu0 %632 }
 0x96d   :  { %1229 = vmatmul.msk.f32.vlgmr.msrb.gmra.mxu1 %vm165_vm5, %v633_v58 }
 0x96e   :  { %976 = vmatpush.msrb.mxu1 %v1464_v5 }
 0x970   :  { %977 = vmatpush.msrb.mxu1 %v1469_v6 }
 0x972   :  { %978 = vmatpush.msrb.mxu1 %v1476_v7 }
 0x974   :  { %979 = vmatpush.msrb.mxu1 %v1483_v8 }
 0x9ca   :  { %v606_v60 = vpop.f32.mrf.mxu0 }
 0x9cb   :  { %v609_v61 = vadd.f32 %v606_v60, %v583_v59 }
 0x9cd   :  { %v610_v62 = vmul.f32 %v609_v61, %v1501_v21 }
 0x9cf   :  { %1291 = vtanh.f32 %v610_v62 }
 0x9d0   :  { %v673_v5 = vpop.f32.mrf.mxu2 }
 0x9d5   :  { %v1292_v63 = vpop.eup %1291 }
 0x9d6   :  { %v612_v0 = vmul.f32 %v1292_v63, %v1501_v21 }
 0x9d8   :  { %v613_v1 = vadd.f32 %v612_v0, %v1504_v26 }
 0x9da   :  { %616 = vrot.lane.b32.xlu1 %v613_v1, %s1384_s3  ;;  %v614_v17 = vmul.f32 %v613_v1, %v499_v48 }
 0x9ea   :  { %v653_v2 = vpop.f32.mrf.mxu1 }
 0x9eb   :  { %v674_v6 = vadd.f32 %v673_v5, %v653_v2  ;;  %v833_v2 = vld [vmem:[#allocation2 + $0xc] sm:$0x3] }
 0x9ed   :  { %v676_v7 = vadd.f32 %v1585_v47, %v674_v6 }
 0x9ef   :  { %v677_v8 = vmul.f32 %v676_v7, %v1501_v21 }
 0x9f1   :  { %1293 = vtanh.f32 %v677_v8 }
 0x9f7   :  { %v1294_v3 = vpop.eup %1293 }
 0x9f8   :  { %v679_v9 = vmul.f32 %v1294_v3, %v1501_v21 }
 0x9fa   :  { %v680_v11 = vadd.f32 %v679_v9, %v1504_v26 }
 0x9fc   :  { %683 = vrot.lane.b32.xlu2 %v680_v11, %s1384_s3  ;;  %v681_v22 = vmul.f32 %v680_v11, %v566_v51 }
 0xa4c   :  { %v617_v13 = vpop.permute.xlu1 %616 }
 0xa4d   :  { %v619_v14 = vmul.f32 %v617_v13, %v613_v1 }
 0xa4f   :  { %621 = vrot.lane.b32.xlu0 %v619_v14, %s1385_s17 }
 0xa56   :  { %v684_v4 = vpop.permute.xlu2 %683 }
 0xa57   :  { %v686_v15 = vmul.f32 %v684_v4, %v680_v11 }
 0xa59   :  { %688 = vrot.lane.b32.xlu1 %v686_v15, %s1385_s17 }
 0xac1   :  { %v622_v18 = vpop.permute.xlu0 %621 }
 0xac2   :  { %v1720_v19 = vadd.f32 %v622_v18, %v614_v17 }
 0xac4   :  { %1295 = vtanh.f32 %v1720_v19 }
 0xaca   :  { %v1296_v20 = vpop.eup %1295 }
 0xacb   :  { %627 = vrot.lane.b32.xlu2 %v1296_v20, %s1384_s3  ;;  %v689_v23 = vpop.permute.xlu1 %688 }
 0xacc   :  { %v691_v24 = vadd.f32 %v689_v23, %v681_v22 }
 0xace   :  { %1297 = vtanh.f32 %v691_v24 }
 0xad4   :  { %v1298_v25 = vpop.eup %1297 }
 0xad5   :  { %694 = vrot.lane.b32.xlu0 %v1298_v25, %s1384_s3 }
 0xb25   :  { %v628_v27 = vpop.permute.xlu2 %627 }
 0xb26   :  { %v630_v28 = vmul.f32 %v628_v27, %v613_v1 }
 0xb28   :  { %710 = vrot.lane.b32.xlu1 %v630_v28, %s1385_s17 }
 0xb47   :  { %v695_v29 = vpop.permute.xlu0 %694 }
 0xb48   :  { %v1726_v30 = vmul.f32 %v695_v29, %v680_v11 }
 0xb4a   :  { %757 = vrot.lane.b32.xlu2 %v1726_v30, %s1385_s17 }
 0xb9a   :  { %v711_v31 = vpop.permute.xlu1 %710 }
 0xb9b   :  { %1232 = vmatmul.msk.f32.vlgmr.msrb.gmra.mxu3 %vm165_vm5, %v711_v31  ;;  %1234 = vmatmul.msk.f32.vlgmr.msra.gmra.mxu1 %vm165_vm5, %v711_v31 }
 0xb9c   :  { %1043 = vmatpush.msrb.mxu3 %v1522_v37  ;;  %1124 = vmatpush.msra.mxu1 %v1522_v37  ;;  %v708_v37 = vld [vmem:[#allocation2 + $0xa] sm:$0x3] }
 0xb9e   :  { %1044 = vmatpush.msrb.mxu3 %v1527_v38  ;;  %1125 = vmatpush.msra.mxu1 %v1527_v38 }
 0xba0   :  { %1045 = vmatpush.msrb.mxu3 %v1537_v40  ;;  %1126 = vmatpush.msra.mxu1 %v1537_v40 }
 0xba2   :  { %1046 = vmatpush.msrb.mxu3 %v1547_v42  ;;  %1127 = vmatpush.msra.mxu1 %v1547_v42 }
 0xba4   :  { %v758_v32 = vpop.permute.xlu2 %757 }
 0xba5   :  { %1233 = vmatmul.msk.f32.vlgmr.msrb.gmra.mxu0 %vm165_vm5, %v758_v32 }
 0xba6   :  { %1099 = vmatpush.msrb.mxu0 %v1514_v35 }
 0xba8   :  { %1100 = vmatpush.msrb.mxu0 %v1516_v36 }
 0xbaa   :  { %1101 = vmatpush.msrb.mxu0 %v1529_v39 }
 0xbac   :  { %1102 = vmatpush.msrb.mxu0 %v1539_v41 }
 0xc18   :  { %v798_v34 = vpop.f32.mrf.mxu1 }
 0xc1e   :  { %v731_v38 = vpop.f32.mrf.mxu3 }
 0xc1f   :  { %v734_v33 = vadd.f32 %v731_v38, %v708_v37 }
 0xc21   :  { %v735_v40 = vmul.f32 %v734_v33, %v1501_v21 }
 0xc22   :  { %v778_v43 = vpop.f32.mrf.mxu0 }
 0xc23   :  { %1299 = vtanh.f32 %v735_v40  ;;  %v799_v42 = vadd.f32 %v798_v34, %v778_v43 }
 0xc25   :  { %v801_v44 = vadd.f32 %v1585_v47, %v799_v42 }
 0xc27   :  { %v802_v45 = vmul.f32 %v801_v44, %v1501_v21 }
 0xc29   :  { %v1300_v35 = vpop.eup %1299  ;;  %1301 = vtanh.f32 %v802_v45 }
 0xc2a   :  { %v737_v36 = vmul.f32 %v1300_v35, %v1501_v21  ;;  %v958_v35 = vld [vmem:[#allocation2 + $0xe] sm:$0x3] }
 0xc2c   :  { %v738_v39 = vadd.f32 %v737_v36, %v1504_v26 }
 0xc2e   :  { %741 = vrot.lane.b32.xlu1 %v738_v39, %s1384_s3  ;;  %v739_v57 = vmul.f32 %v738_v39, %v1720_v19 }
 0xc2f   :  { %v1302_v41 = vpop.eup %1301 }
 0xc30   :  { %v804_v46 = vmul.f32 %v1302_v41, %v1501_v21 }
 0xc32   :  { %v805_v48 = vadd.f32 %v804_v46, %v1504_v26 }
 0xc34   :  { %808 = vrot.lane.b32.xlu0 %v805_v48, %s1384_s3  ;;  %v806_v52 = vmul.f32 %v805_v48, %v691_v24 }
 0xca0   :  { %v742_v49 = vpop.permute.xlu1 %741 }
 0xca1   :  { %v744_v12 = vmul.f32 %v742_v49, %v738_v39 }
 0xca3   :  { %746 = vrot.lane.b32.xlu0 %v744_v12, %s1385_s17 }
 0xca6   :  { %v809_v50 = vpop.permute.xlu0 %808 }
 0xca7   :  { %v811_v51 = vmul.f32 %v809_v50, %v805_v48 }
 0xca9   :  { %813 = vrot.lane.b32.xlu2 %v811_v51, %s1385_s17 }
 0xd03   :  { %v814_v53 = vpop.permute.xlu2 %813 }
 0xd04   :  { %v816_v54 = vadd.f32 %v814_v53, %v806_v52 }
 0xd06   :  { %1303 = vtanh.f32 %v816_v54 }
 0xd0c   :  { %v1304_v55 = vpop.eup %1303 }
 0xd0d   :  { %819 = vrot.lane.b32.xlu1 %v1304_v55, %s1384_s3 }
 0xd15   :  { %v747_v58 = vpop.permute.xlu0 %746 }
 0xd16   :  { %v749_v59 = vadd.f32 %v747_v58, %v739_v57 }
 0xd18   :  { %1305 = vtanh.f32 %v749_v59 }
 0xd1e   :  { %v1306_v60 = vpop.eup %1305 }
 0xd1f   :  { %752 = vrot.lane.b32.xlu2 %v1306_v60, %s1384_s3 }
 0xd79   :  { %v753_v61 = vpop.permute.xlu2 %752 }
 0xd7a   :  { %v755_v62 = vmul.f32 %v753_v61, %v738_v39 }
 0xd7c   :  { %835 = vrot.lane.b32.xlu1 %v755_v62, %s1385_s17 }
 0xd7f   :  { %v820_v63 = vpop.permute.xlu1 %819 }
 0xd80   :  { %v1760_v0 = vmul.f32 %v820_v63, %v805_v48 }
 0xd82   :  { %882 = vrot.lane.b32.xlu0 %v1760_v0, %s1385_s17 }
 0xdee   :  { %v836_v1 = vpop.permute.xlu1 %835 }
 0xdef   :  { %1236 = vmatmul.msk.f32.vlgmr.msra.gmra.mxu2 %vm165_vm5, %v836_v1  ;;  %1238 = vmatmul.msk.f32.vlgmr.msra.gmra.mxu0 %vm165_vm5, %v836_v1 }
 0xdf4   :  { %v883_v5 = vpop.permute.xlu0 %882 }
 0xdf5   :  { %1237 = vmatmul.msk.f32.vlgmr.msra.gmra.mxu3 %vm165_vm5, %v883_v5 }
 0xe6c   :  { %v923_v3 = vpop.f32.mrf.mxu0 }
 0xe72   :  { %v856_v6 = vpop.f32.mrf.mxu2 }
 0xe73   :  { %v859_v7 = vadd.f32 %v856_v6, %v833_v2 }
 0xe75   :  { %v860_v8 = vmul.f32 %v859_v7, %v1501_v21 }
 0xe77   :  { %1307 = vtanh.f32 %v860_v8 }
 0xe78   :  { %v903_v9 = vpop.f32.mrf.mxu3 }
 0xe79   :  { %v924_v11 = vadd.f32 %v923_v3, %v903_v9  ;;  %v1386_v3 = vmov 0  }
 0xe7a   :  { %1257 = vset.pattern.permute.xlu2 %v1386_v3  ;;  %1258 = vset.pattern.permute.xlu0 %v1386_v3 }
 0xe7b   :  { %v926_v13 = vadd.f32 %v1585_v47, %v924_v11  ;;  %1259 = vset.pattern.permute.xlu1 %v1386_v3 }
 0xe7d   :  { %v1308_v14 = vpop.eup %1307  ;;  %v927_v4 = vmul.f32 %v926_v13, %v1501_v21  ;;  %v325_v13 = vld [vmem:[%s1869_s7] sm:$0x3] }
 0xe7e   :  { %v862_v15 = vmul.f32 %v1308_v14, %v1501_v21  ;;  %v1231_v14 = vld [vmem:[%s1869_s7 + $0x6] sm:$0x3] }
 0xe7f   :  { %1309 = vtanh.f32 %v927_v4  ;;  %v1239_v4 = vld [vmem:[%s1869_s7 + $0xa] sm:$0x3] }
 0xe80   :  { %v863_v17 = vadd.f32 %v862_v15, %v1504_v26 }
 0xe82   :  { %866 = vrot.lane.b32.xlu2 %v863_v17, %s1384_s3  ;;  %v864_v27 = vmul.f32 %v863_v17, %v749_v59 }
 0xe85   :  { %v1310_v18 = vpop.eup %1309 }
 0xe86   :  { %v929_v19 = vmul.f32 %v1310_v18, %v1501_v21 }
 0xe88   :  { %v930_v20 = vadd.f32 %v929_v19, %v1504_v26 }
 0xe8a   :  { %933 = vrot.lane.b32.xlu0 %v930_v20, %s1384_s3  ;;  %v931_v31 = vmul.f32 %v930_v20, %v816_v54 }
 0xedc   :  { %v867_v22 = vpop.permute.xlu2 %866 }
 0xedd   :  { %v869_v23 = vmul.f32 %v867_v22, %v863_v17 }
 0xedf   :  { %871 = vrot.lane.b32.xlu1 %v869_v23, %s1385_s17 }
 0xefc   :  { %v934_v24 = vpop.permute.xlu0 %933 }
 0xefd   :  { %v936_v25 = vmul.f32 %v934_v24, %v930_v20 }
 0xeff   :  { %938 = vrot.lane.b32.xlu2 %v936_v25, %s1385_s17 }
 0xf51   :  { %v872_v28 = vpop.permute.xlu1 %871 }
 0xf52   :  { %v874_v29 = vadd.f32 %v872_v28, %v864_v27 }
 0xf54   :  { %1311 = vtanh.f32 %v874_v29 }
 0xf59   :  { %v939_v32 = vpop.permute.xlu2 %938 }
 0xf5a   :  { %v1312_v37 = vpop.eup %1311  ;;  %v941_v38 = vadd.f32 %v939_v32, %v931_v31  ;;  %v1223_v31 = vld [vmem:[%s1869_s7 + $0x2] sm:$0x3]  ;;  %v1243_v32 = vld [vmem:[%s1869_s7 + $0xc] sm:$0x3] }
 0xf5b   :  { %877 = vrot.lane.b32.xlu0 %v1312_v37, %s1384_s3 }
 0xf5c   :  { %1313 = vtanh.f32 %v941_v38 }
 0xf62   :  { %v1314_v33 = vpop.eup %1313 }
 0xf63   :  { %944 = vrot.lane.b32.xlu1 %v1314_v33, %s1384_s3 }
 0xfcd   :  { %v878_v40 = vpop.permute.xlu0 %877 }
 0xfce   :  { %v880_v34 = vmul.f32 %v878_v40, %v863_v17 }
 0xfd0   :  { %960 = vrot.lane.b32.xlu2 %v880_v34, %s1385_s17 }
 0xfd5   :  { %v945_v43 = vpop.permute.xlu1 %944 }
 0xfd6   :  { %v1781_v42 = vmul.f32 %v945_v43, %v930_v20 }
 0xfd8   :  { %1007 = vrot.lane.b32.xlu0 %v1781_v42, %s1385_s17 }
0x102a   :  { %v961_v44 = vpop.permute.xlu2 %960 }
0x102b   :  { %1240 = vmatmul.msk.f32.vlgmr.msrb.gmra.mxu1 %vm165_vm5, %v961_v44  ;;  %1242 = vmatmul.msk.f32.vlgmr.msrb.gmra.mxu3 %vm165_vm5, %v961_v44 }
0x104a   :  { %v1008_v45 = vpop.permute.xlu0 %1007 }
0x104b   :  { %1241 = vmatmul.msk.f32.vlgmr.msrb.gmra.mxu2 %vm165_vm5, %v1008_v45  ;;  %v1166_v45 = vld [vmem:[%s1870_s8 + $0x18] sm:$0xff] }
0x104c   :  { %1188 = vmatpush.msra.mxu2 %v1166_v45 }
0x10a8   :  { %v981_v36 = vpop.f32.mrf.mxu1 }
0x10a9   :  { %v984_v39 = vadd.f32 %v981_v36, %v958_v35  ;;  %v1165_v35 = vld [vmem:[%s1870_s8 + $0x10] sm:$0xff]  ;;  %v1164_v36 = vld [vmem:[%s1870_s8 + $0x8] sm:$0xff] }
0x10aa   :  { %1189 = vmatpush.msra.mxu2 %v1165_v35 }
0x10ab   :  { %v985_v41 = vmul.f32 %v984_v39, %v1501_v21 }
0x10ac   :  { %1190 = vmatpush.msra.mxu2 %v1164_v36 }
0x10ad   :  { %1315 = vtanh.f32 %v985_v41  ;;  %v1163_v41 = vld [vmem:[%s1870_s8] sm:$0xff] }
0x10ae   :  { %v1048_v12 = vpop.f32.mrf.mxu3  ;;  %1191 = vmatpush.msra.mxu2 %v1163_v41 }
0x10b3   :  { %v1316_v46 = vpop.eup %1315 }
0x10b4   :  { %v987_v48 = vmul.f32 %v1316_v46, %v1501_v21 }
0x10b6   :  { %v988_v49 = vadd.f32 %v987_v48, %v1504_v26 }
0x10b8   :  { %991 = vrot.lane.b32.xlu1 %v988_v49, %s1384_s3  ;;  %v989_v62 = vmul.f32 %v988_v49, %v874_v29 }
0x10ce   :  { %v1028_v50 = vpop.f32.mrf.mxu2 }
0x10cf   :  { %v1049_v51 = vadd.f32 %v1048_v12, %v1028_v50 }
0x10d1   :  { %v1051_v52 = vadd.f32 %v1585_v47, %v1049_v51 }
0x10d3   :  { %v1052_v53 = vmul.f32 %v1051_v52, %v1501_v21 }
0x10d5   :  { %1317 = vtanh.f32 %v1052_v53 }
0x10db   :  { %v1318_v54 = vpop.eup %1317 }
0x10dc   :  { %v1054_v55 = vmul.f32 %v1318_v54, %v1501_v21 }
0x10de   :  { %v1055_v57 = vadd.f32 %v1054_v55, %v1504_v26 }
0x10e0   :  { %1058 = vrot.lane.b32.xlu2 %v1055_v57, %s1384_s3  ;;  %v1056_v2 = vmul.f32 %v1055_v57, %v941_v38  ;;  %v1246_v38 = vld [vmem:[%s1869_s7 + $0xe] sm:$0x3] }
0x112a   :  { %v992_v58 = vpop.permute.xlu1 %991 }
0x112b   :  { %v994_v59 = vmul.f32 %v992_v58, %v988_v49 }
0x112d   :  { %996 = vrot.lane.b32.xlu0 %v994_v59, %s1385_s17 }
0x113a   :  { %v1059_v60 = vpop.permute.xlu2 %1058 }
0x113b   :  { %v1061_v61 = vmul.f32 %v1059_v60, %v1055_v57 }
0x113d   :  { %1063 = vrot.lane.b32.xlu1 %v1061_v61, %s1385_s17 }
0x119f   :  { %v997_v63 = vpop.permute.xlu0 %996 }
0x11a0   :  { %v999_v1 = vadd.f32 %v997_v63, %v989_v62 }
0x11a2   :  { %1319 = vtanh.f32 %v999_v1 }
0x11a8   :  { %v1320_v5 = vpop.eup %1319 }
0x11a9   :  { %1002 = vrot.lane.b32.xlu2 %v1320_v5, %s1384_s3 }
0x11af   :  { %v1064_v6 = vpop.permute.xlu1 %1063 }
0x11b0   :  { %v1066_v7 = vadd.f32 %v1064_v6, %v1056_v2 }
0x11b2   :  { %1321 = vtanh.f32 %v1066_v7 }
0x11b8   :  { %v1322_v8 = vpop.eup %1321 }
0x11b9   :  { %1069 = vrot.lane.b32.xlu0 %v1322_v8, %s1384_s3 }
0x1203   :  { %v1003_v9 = vpop.permute.xlu2 %1002 }
0x1204   :  { %v1005_v11 = vmul.f32 %v1003_v9, %v988_v49 }
0x1206   :  { %1108 = vrot.lane.b32.xlu2 %v1005_v11, %s1385_s17 }
0x120e   :  { %328 = vperm.xlu2 %1257, %v325_v13  }
0x1216   :  { %702 = vperm.xlu2 %1257, %v1231_v14  }
0x121e   :  { %952 = vperm.xlu2 %1257, %v1239_v4  }
0x1226   :  { %1158 = vperm.xlu2 %1257, %v1246_v38  }
0x122b   :  { %v1070_v15 = vpop.permute.xlu0 %1069 }
0x122c   :  { %v1072_v17 = vmul.f32 %v1070_v15, %v1055_v57 }
0x122e   :  { %1083 = vrot.lane.b32.xlu1 %v1072_v17, %s1385_s17 }
0x1260   :  { %v1109_v18 = vpop.permute.xlu2 %1108 }
0x1261   :  { %1245 = vmatmul.msk.f32.vlgmr.msra.gmra.mxu1 %vm165_vm5, %v1109_v18 }
0x1268   :  { %v329_v44 = vpop.permute.xlu2 %328 }
0x1269   :  { %v331_v12 = vmul.f32 %v329_v44, %v1607_v16 }
0x1270   :  { %v703_v49 = vpop.permute.xlu2 %702 }
0x1271   :  { %v705_v54 = vmul.f32 %v703_v49, %v1726_v30  ;;  %v1262_v30 = vld [vmem:[%s1871_s9] ss:$0 sm:$0xff] }
0x1278   :  { %v953_v58 = vpop.permute.xlu2 %952 }
0x1279   :  { %v955_v60 = vmul.f32 %v953_v58, %v1781_v42 }
0x1280   :  { %v1159_v16 = vpop.permute.xlu2 %1158 }
0x12a0   :  { %v1084_v19 = vpop.permute.xlu1 %1083 }
0x12a1   :  { %1244 = vmatmul.msk.f32.vlgmr.msrb.gmra.mxu0 %vm165_vm5, %v1084_v19 }
0x12de   :  { %v1129_v20 = vpop.f32.mrf.mxu1 }
0x131e   :  { %v1104_v22 = vpop.f32.mrf.mxu0 }
0x131f   :  { %v1130_v23 = vadd.f32 %v1129_v20, %v1104_v22 }
0x1321   :  { %v1132_v24 = vadd.f32 %v1585_v47, %v1130_v23 }
0x1323   :  { %v1133_v25 = vmul.f32 %v1132_v24, %v1501_v21 }
0x1325   :  { %1323 = vtanh.f32 %v1133_v25 }
0x132b   :  { %v1324_v27 = vpop.eup %1323 }
0x132c   :  { %v1135_v28 = vmul.f32 %v1324_v27, %v1501_v21  ;;  %v1227_v21 = vld [vmem:[%s1869_s7 + $0x4] sm:$0x3] }
0x132e   :  { %v1136_v29 = vadd.f32 %v1135_v28, %v1504_v26  ;;  %v1235_v26 = vld [vmem:[%s1869_s7 + $0x8] sm:$0x3] }
0x1330   :  { %1139 = vrot.lane.b32.xlu0 %v1136_v29, %s1384_s3  ;;  %v1137_v33 = vmul.f32 %v1136_v29, %v1066_v7 }
0x1338   :  { %452 = vperm.xlu0 %1258, %v1223_v31  }
0x1340   :  { %1077 = vperm.xlu0 %1258, %v1243_v32  }
0x13a2   :  { %v1140_v47 = vpop.permute.xlu0 %1139 }
0x13a3   :  { %v1142_v37 = vmul.f32 %v1140_v47, %v1136_v29 }
0x13a5   :  { %1144 = vrot.lane.b32.xlu1 %v1142_v37, %s1385_s17 }
0x13aa   :  { %v453_v46 = vpop.permute.xlu0 %452 }
0x13ab   :  { %v455_v48 = vmul.f32 %v453_v46, %v1656_v10 }
0x13ad   :  { %577 = vperm.xlu1 %1259, %v1227_v21   ;;  %v456_v51 = vmax.f32 %v331_v12, %v455_v48 }
0x13b2   :  { %v1078_v61 = vpop.permute.xlu0 %1077 }
0x13b3   :  { %v1080_v63 = vmul.f32 %v1078_v61, %v1072_v17 }
0x13b5   :  { %827 = vperm.xlu1 %1259, %v1235_v26  }
0x1417   :  { %v1145_v40 = vpop.permute.xlu1 %1144 }
0x1418   :  { %v1147_v34 = vadd.f32 %v1145_v40, %v1137_v33 }
0x141a   :  { %1325 = vtanh.f32 %v1147_v34 }
0x141f   :  { %v578_v39 = vpop.permute.xlu1 %577 }
0x1420   :  { %v1326_v43 = vpop.eup %1325  ;;  %v580_v50 = vmul.f32 %v578_v39, %v1690_v56 }
0x1421   :  { %1150 = vrot.lane.b32.xlu1 %v1326_v43, %s1384_s3 }
0x1422   :  { %v581_v53 = vmax.f32 %v456_v51, %v580_v50 }
0x1424   :  { %v706_v57 = vmax.f32 %v581_v53, %v705_v54 }
0x1427   :  { %v828_v52 = vpop.permute.xlu1 %827 }
0x1428   :  { %v830_v55 = vmul.f32 %v828_v52, %v1760_v0 }
0x142a   :  { %v831_v59 = vmax.f32 %v706_v57, %v830_v55 }
0x142c   :  { %v956_v62 = vmax.f32 %v831_v59, %v955_v60 }
0x142e   :  { %v1081_v56 = vmax.f32 %v956_v62, %v1080_v63 }
0x1493   :  { %v1151_v10 = vpop.permute.xlu1 %1150 }
0x1494   :  { %v1153_v1 = vmul.f32 %v1151_v10, %v1136_v29 }
0x1496   :  { %v1161_v5 = vmul.f32 %v1159_v16, %v1153_v1 }
0x1498   :  { %v1162_v2 = vmax.f32 %v1081_v56, %v1161_v5 }
0x149a   :  { %1172 = vrot.lane.b32.xlu0 %v1162_v2, %s1385_s17 }
0x150c   :  { %v1173_v6 = vpop.permute.xlu0 %1172 }
0x150d   :  { %1247 = vmatmul.msk.f32.vlgmr.msra.gmra.mxu2 %vm165_vm5, %v1173_v6 }
0x1590   :  { %v1193_v0 = vpop.f32.mrf.mxu2 }
0x1591   :  { %v1194_v42 = vadd.f32 %v1262_v30, %v1193_v0 }
0x1593   :  { %1197 = vst.msk [vmem:[#allocation6] sm:$0x3] %vm1196_vm6, %v1194_v42 }
0x1594   :  { %1208 = dma.vmem_to_hbm [thread:$0]  %s1204_s11, 32, %s1206_s13, [#allocation5]  }
0x1595   :  { %1377 = dma.done.wait [#allocation5], 32  }
0x1596   :  { %1378 = vsyncadd [#allocation5], 4294967264 }
0x1597   :  { %1213 = vsyncpa [#allocation4], 1 }
0x1598   :  { %1214 = vsyncpa [#allocation5], 1 }

</bundles_post_ra>
